<compile_context>
chip_gen: v6e
topology: v6e:2x2x1
jax: 0.10.0
libtpu: 0.0.40
codegen_flags: <defaults>
</compile_context>

<pallas_src>
import functools

import jax
import jax.numpy as jnp
from jax.experimental import pallas as pl
from jax.experimental.pallas import tpu as pltpu

# Layer dimensions, matching the PyTorch module.
DIMS = [384, 300, 200, 128, 512, 256, 128, 3]
NEG_SLOPE = 0.01   # F.leaky_relu default
OUT_PAD = 128      # lane-dense padded output width; first 3 columns are real


def _leaky_relu(x):
    return jnp.where(x > 0, x, NEG_SLOPE * x)


def _round_up(x, m):
    return (x + m - 1) // m * m


def thai_life_kernel(x_ref,
                     w1_ref, b1_ref, w2_ref, b2_ref, w3_ref, b3_ref,
                     w4_ref, b4_ref, w5_ref, b5_ref, w6_ref, b6_ref,
                     w7_ref, b7_ref,
                     o_ref):
    # Hot path: seven bf16 MXU matmuls (f32 accumulate) + bias + leaky_relu.
    h = x_ref[...]                                    # bf16 (tile_m, 384)
    ws = (w1_ref, w2_ref, w3_ref, w4_ref, w5_ref, w6_ref, w7_ref)
    bs = (b1_ref, b2_ref, b3_ref, b4_ref, b5_ref, b6_ref, b7_ref)
    for li, (w_ref, b_ref) in enumerate(zip(ws, bs)):
        acc = jnp.dot(h, w_ref[...], preferred_element_type=jnp.float32)
        acc = acc + b_ref[...]                        # f32 bias (1, out) broadcast
        if li < 6:                                    # last layer (fc4): no activation
            h = _leaky_relu(acc).astype(jnp.bfloat16)
        else:
            h = acc
    o_ref[...] = h.astype(o_ref.dtype)                # dense (tile_m, 128) store


def prepare_kernel_params(params):
    """Cast weights to bf16 (MXU-native) and lane-pad the final layer to 128."""
    flat = []
    for li, (w, b) in enumerate(params):
        if li == 6:  # pad 128->3 layer out to 128 columns with zeros
            w = jnp.pad(w, ((0, 0), (0, OUT_PAD - DIMS[-1])))
            b = jnp.pad(b, ((0, 0), (0, OUT_PAD - DIMS[-1])))
        flat.append(w.astype(jnp.bfloat16))
        flat.append(b.astype(jnp.float32))
    return flat


@functools.partial(jax.jit, static_argnames=("tile_m",))
def thai_life_forward(x, kernel_params, *, tile_m=512):
    """x: (..., 384); returns (N, 3) float32 where N = prod(leading dims)."""
    x2 = x.reshape(-1, DIMS[0]).astype(jnp.bfloat16)   # mirrors x.view(-1, 384)
    n = x2.shape[0]
    # Keep at least 2 grid steps when the batch allows (v7x megacore), capped at
    # tile_m; tm is always a multiple of 8 (sublane constraint).
    tm = max(8, min(tile_m, _round_up(pl.cdiv(n, 2), 8)))
    grid = (pl.cdiv(n, tm),)

    # Batch is tiled; each weight/bias is the whole array, resident in VMEM
    # (no index_map / no per-step double-buffered pipeline reservation).
    in_specs = [pl.BlockSpec((tm, DIMS[0]), lambda i: (i, 0))]
    in_specs += [pl.BlockSpec(memory_space=pltpu.MemorySpace.VMEM)] * 14
    out_spec = pl.BlockSpec((tm, OUT_PAD), lambda i: (i, 0))

    out = pl.pallas_call(
        thai_life_kernel,
        out_shape=jax.ShapeDtypeStruct((n, OUT_PAD), jnp.float32),
        grid_spec=pltpu.PrefetchScalarGridSpec(
            num_scalar_prefetch=0,
            grid=grid,
            in_specs=in_specs,
            out_specs=out_spec,
        ),
        compiler_params=pltpu.CompilerParams(
            dimension_semantics=("parallel",)),
    )(x2, *kernel_params)
    return out[:, :DIMS[-1]]


def init_params(key):
    """Deterministic init, PyTorch-Linear-style uniform(-1/sqrt(in), 1/sqrt(in)).

    Weights are stored transposed: (in_features, out_features)."""
    params = []
    for li in range(7):
        d_in, d_out = DIMS[li], DIMS[li + 1]
        key, kw, kb = jax.random.split(key, 3)
        bound = 1.0 / (d_in ** 0.5)
        w = jax.random.uniform(kw, (d_in, d_out), jnp.float32, -bound, bound)
        b = jax.random.uniform(kb, (1, d_out), jnp.float32, -bound, bound)
        params.append((w, b))
    return params


def reference_forward(x, params):
    h = x.reshape(-1, DIMS[0])
    for li, (w, b) in enumerate(params):
        h = h @ w + b
        if li < 6:
            h = _leaky_relu(h)
    return h


if __name__ == "__main__":
    key = jax.random.PRNGKey(0)
    kx, kp = jax.random.split(key)
    params = init_params(kp)                       # f32 reference params
    kernel_params = prepare_kernel_params(params)  # bf16 / padded kernel params

    # Small input consistent with forward's x.view(-1, 384): 2*8 = 16 rows.
    x = jax.random.normal(kx, (2, 8, 384), jnp.float32)

    out = thai_life_forward(x, kernel_params)
    out = jax.block_until_ready(out)

    ref = reference_forward(x, params)
    assert out.shape == (16, 3), out.shape
    # bf16 matmul inputs (f32 accumulate) -> relaxed tolerance vs f32 reference.
    max_err = jnp.max(jnp.abs(out - ref))
    assert jnp.allclose(out, ref, atol=5e-3, rtol=5e-2), (
        f"mismatch vs reference, max_abs_err={max_err}")

    print("KERNEL_OK")
</pallas_src>

<mosaic_0001>
module attributes {stable_mosaic.version = 11 : i64} {
  func.func @thai_life_kernel(%arg0: i32, %arg1: memref<8x384xbf16, #tpu.memory_space<vmem>>, %arg2: memref<384x300xbf16, #tpu.memory_space<vmem>>, %arg3: memref<1x300xf32, #tpu.memory_space<vmem>>, %arg4: memref<300x200xbf16, #tpu.memory_space<vmem>>, %arg5: memref<1x200xf32, #tpu.memory_space<vmem>>, %arg6: memref<200x128xbf16, #tpu.memory_space<vmem>>, %arg7: memref<1x128xf32, #tpu.memory_space<vmem>>, %arg8: memref<128x512xbf16, #tpu.memory_space<vmem>>, %arg9: memref<1x512xf32, #tpu.memory_space<vmem>>, %arg10: memref<512x256xbf16, #tpu.memory_space<vmem>>, %arg11: memref<1x256xf32, #tpu.memory_space<vmem>>, %arg12: memref<256x128xbf16, #tpu.memory_space<vmem>>, %arg13: memref<1x128xf32, #tpu.memory_space<vmem>>, %arg14: memref<128x128xbf16, #tpu.memory_space<vmem>>, %arg15: memref<1x128xf32, #tpu.memory_space<vmem>>, %arg16: memref<8x128xf32, #tpu.memory_space<vmem>>) attributes {dimension_semantics = [#tpu.dimension_semantics<parallel>], iteration_bounds = array<i64: 2>, scalar_prefetch = 0 : i64, scratch_operands = 0 : i64, tpu.core_type = #tpu.core_type<tc>, window_params = [{transform_indices = @transform_0, window_bounds = array<i64: 8, 384>}, {pipeline_mode = #tpu.pipeline_mode<synchronous>, transform_indices = @transform_1, window_bounds = array<i64: 384, 300>}, {pipeline_mode = #tpu.pipeline_mode<synchronous>, transform_indices = @transform_2, window_bounds = array<i64: 1, 300>}, {pipeline_mode = #tpu.pipeline_mode<synchronous>, transform_indices = @transform_3, window_bounds = array<i64: 300, 200>}, {pipeline_mode = #tpu.pipeline_mode<synchronous>, transform_indices = @transform_4, window_bounds = array<i64: 1, 200>}, {pipeline_mode = #tpu.pipeline_mode<synchronous>, transform_indices = @transform_5, window_bounds = array<i64: 200, 128>}, {pipeline_mode = #tpu.pipeline_mode<synchronous>, transform_indices = @transform_6, window_bounds = array<i64: 1, 128>}, {pipeline_mode = #tpu.pipeline_mode<synchronous>, transform_indices = @transform_7, window_bounds = array<i64: 128, 512>}, {pipeline_mode = #tpu.pipeline_mode<synchronous>, transform_indices = @transform_8, window_bounds = array<i64: 1, 512>}, {pipeline_mode = #tpu.pipeline_mode<synchronous>, transform_indices = @transform_9, window_bounds = array<i64: 512, 256>}, {pipeline_mode = #tpu.pipeline_mode<synchronous>, transform_indices = @transform_10, window_bounds = array<i64: 1, 256>}, {pipeline_mode = #tpu.pipeline_mode<synchronous>, transform_indices = @transform_11, window_bounds = array<i64: 256, 128>}, {pipeline_mode = #tpu.pipeline_mode<synchronous>, transform_indices = @transform_12, window_bounds = array<i64: 1, 128>}, {pipeline_mode = #tpu.pipeline_mode<synchronous>, transform_indices = @transform_13, window_bounds = array<i64: 128, 128>}, {pipeline_mode = #tpu.pipeline_mode<synchronous>, transform_indices = @transform_14, window_bounds = array<i64: 1, 128>}, {transform_indices = @transform_15, window_bounds = array<i64: 8, 128>}]} {
    %c0 = arith.constant 0 : index
    %c0_0 = arith.constant 0 : index
    %0 = vector.load %arg1[%c0, %c0_0] : memref<8x384xbf16, #tpu.memory_space<vmem>>, vector<8x384xbf16>
    %c0_1 = arith.constant 0 : index
    %c0_2 = arith.constant 0 : index
    %1 = vector.load %arg2[%c0_1, %c0_2] : memref<384x300xbf16, #tpu.memory_space<vmem>>, vector<384x300xbf16>
    %cst = arith.constant dense<0.000000e+00> : vector<8x300xf32>
    %2 = tpu.matmul %0, %1, %cst {dimension_numbers = #tpu.dot_dimension_numbers<[1], [0], [0], [1], [0, 0, 1, 1], [], []>} : vector<8x384xbf16>, vector<384x300xbf16>, vector<8x300xf32> -> vector<8x300xf32>
    %c0_3 = arith.constant 0 : index
    %c0_4 = arith.constant 0 : index
    %3 = vector.load %arg3[%c0_3, %c0_4] : memref<1x300xf32, #tpu.memory_space<vmem>>, vector<1x300xf32>
    %4 = vector.broadcast %3 : vector<1x300xf32> to vector<8x300xf32>
    %5 = arith.addf %2, %4 : vector<8x300xf32>
    %cst_5 = arith.constant 0.000000e+00 : f32
    %6 = vector.broadcast %cst_5 : f32 to vector<8x300xf32>
    %7 = arith.cmpf ogt, %5, %6 : vector<8x300xf32>
    %cst_6 = arith.constant 0.00999999977 : f32
    %8 = vector.broadcast %cst_6 : f32 to vector<8x300xf32>
    %9 = arith.mulf %8, %5 : vector<8x300xf32>
    %10 = arith.select %7, %5, %9 : vector<8x300xi1>, vector<8x300xf32>
    %11 = arith.truncf %10 : vector<8x300xf32> to vector<8x300xbf16>
    %c0_7 = arith.constant 0 : index
    %c0_8 = arith.constant 0 : index
    %12 = vector.load %arg4[%c0_7, %c0_8] : memref<300x200xbf16, #tpu.memory_space<vmem>>, vector<300x200xbf16>
    %cst_9 = arith.constant dense<0.000000e+00> : vector<8x200xf32>
    %13 = tpu.matmul %11, %12, %cst_9 {dimension_numbers = #tpu.dot_dimension_numbers<[1], [0], [0], [1], [0, 0, 1, 1], [], []>} : vector<8x300xbf16>, vector<300x200xbf16>, vector<8x200xf32> -> vector<8x200xf32>
    %c0_10 = arith.constant 0 : index
    %c0_11 = arith.constant 0 : index
    %14 = vector.load %arg5[%c0_10, %c0_11] : memref<1x200xf32, #tpu.memory_space<vmem>>, vector<1x200xf32>
    %15 = vector.broadcast %14 : vector<1x200xf32> to vector<8x200xf32>
    %16 = arith.addf %13, %15 : vector<8x200xf32>
    %cst_12 = arith.constant 0.000000e+00 : f32
    %17 = vector.broadcast %cst_12 : f32 to vector<8x200xf32>
    %18 = arith.cmpf ogt, %16, %17 : vector<8x200xf32>
    %cst_13 = arith.constant 0.00999999977 : f32
    %19 = vector.broadcast %cst_13 : f32 to vector<8x200xf32>
    %20 = arith.mulf %19, %16 : vector<8x200xf32>
    %21 = arith.select %18, %16, %20 : vector<8x200xi1>, vector<8x200xf32>
    %22 = arith.truncf %21 : vector<8x200xf32> to vector<8x200xbf16>
    %c0_14 = arith.constant 0 : index
    %c0_15 = arith.constant 0 : index
    %23 = vector.load %arg6[%c0_14, %c0_15] : memref<200x128xbf16, #tpu.memory_space<vmem>>, vector<200x128xbf16>
    %cst_16 = arith.constant dense<0.000000e+00> : vector<8x128xf32>
    %24 = tpu.matmul %22, %23, %cst_16 {dimension_numbers = #tpu.dot_dimension_numbers<[1], [0], [0], [1], [0, 0, 1, 1], [], []>} : vector<8x200xbf16>, vector<200x128xbf16>, vector<8x128xf32> -> vector<8x128xf32>
    %c0_17 = arith.constant 0 : index
    %c0_18 = arith.constant 0 : index
    %25 = vector.load %arg7[%c0_17, %c0_18] : memref<1x128xf32, #tpu.memory_space<vmem>>, vector<1x128xf32>
    %26 = vector.broadcast %25 : vector<1x128xf32> to vector<8x128xf32>
    %27 = arith.addf %24, %26 : vector<8x128xf32>
    %cst_19 = arith.constant 0.000000e+00 : f32
    %28 = vector.broadcast %cst_19 : f32 to vector<8x128xf32>
    %29 = arith.cmpf ogt, %27, %28 : vector<8x128xf32>
    %cst_20 = arith.constant 0.00999999977 : f32
    %30 = vector.broadcast %cst_20 : f32 to vector<8x128xf32>
    %31 = arith.mulf %30, %27 : vector<8x128xf32>
    %32 = arith.select %29, %27, %31 : vector<8x128xi1>, vector<8x128xf32>
    %33 = arith.truncf %32 : vector<8x128xf32> to vector<8x128xbf16>
    %c0_21 = arith.constant 0 : index
    %c0_22 = arith.constant 0 : index
    %34 = vector.load %arg8[%c0_21, %c0_22] : memref<128x512xbf16, #tpu.memory_space<vmem>>, vector<128x512xbf16>
    %cst_23 = arith.constant dense<0.000000e+00> : vector<8x512xf32>
    %35 = tpu.matmul %33, %34, %cst_23 {dimension_numbers = #tpu.dot_dimension_numbers<[1], [0], [0], [1], [0, 0, 1, 1], [], []>} : vector<8x128xbf16>, vector<128x512xbf16>, vector<8x512xf32> -> vector<8x512xf32>
    %c0_24 = arith.constant 0 : index
    %c0_25 = arith.constant 0 : index
    %36 = vector.load %arg9[%c0_24, %c0_25] : memref<1x512xf32, #tpu.memory_space<vmem>>, vector<1x512xf32>
    %37 = vector.broadcast %36 : vector<1x512xf32> to vector<8x512xf32>
    %38 = arith.addf %35, %37 : vector<8x512xf32>
    %cst_26 = arith.constant 0.000000e+00 : f32
    %39 = vector.broadcast %cst_26 : f32 to vector<8x512xf32>
    %40 = arith.cmpf ogt, %38, %39 : vector<8x512xf32>
    %cst_27 = arith.constant 0.00999999977 : f32
    %41 = vector.broadcast %cst_27 : f32 to vector<8x512xf32>
    %42 = arith.mulf %41, %38 : vector<8x512xf32>
    %43 = arith.select %40, %38, %42 : vector<8x512xi1>, vector<8x512xf32>
    %44 = arith.truncf %43 : vector<8x512xf32> to vector<8x512xbf16>
    %c0_28 = arith.constant 0 : index
    %c0_29 = arith.constant 0 : index
    %45 = vector.load %arg10[%c0_28, %c0_29] : memref<512x256xbf16, #tpu.memory_space<vmem>>, vector<512x256xbf16>
    %cst_30 = arith.constant dense<0.000000e+00> : vector<8x256xf32>
    %46 = tpu.matmul %44, %45, %cst_30 {dimension_numbers = #tpu.dot_dimension_numbers<[1], [0], [0], [1], [0, 0, 1, 1], [], []>} : vector<8x512xbf16>, vector<512x256xbf16>, vector<8x256xf32> -> vector<8x256xf32>
    %c0_31 = arith.constant 0 : index
    %c0_32 = arith.constant 0 : index
    %47 = vector.load %arg11[%c0_31, %c0_32] : memref<1x256xf32, #tpu.memory_space<vmem>>, vector<1x256xf32>
    %48 = vector.broadcast %47 : vector<1x256xf32> to vector<8x256xf32>
    %49 = arith.addf %46, %48 : vector<8x256xf32>
    %cst_33 = arith.constant 0.000000e+00 : f32
    %50 = vector.broadcast %cst_33 : f32 to vector<8x256xf32>
    %51 = arith.cmpf ogt, %49, %50 : vector<8x256xf32>
    %cst_34 = arith.constant 0.00999999977 : f32
    %52 = vector.broadcast %cst_34 : f32 to vector<8x256xf32>
    %53 = arith.mulf %52, %49 : vector<8x256xf32>
    %54 = arith.select %51, %49, %53 : vector<8x256xi1>, vector<8x256xf32>
    %55 = arith.truncf %54 : vector<8x256xf32> to vector<8x256xbf16>
    %c0_35 = arith.constant 0 : index
    %c0_36 = arith.constant 0 : index
    %56 = vector.load %arg12[%c0_35, %c0_36] : memref<256x128xbf16, #tpu.memory_space<vmem>>, vector<256x128xbf16>
    %cst_37 = arith.constant dense<0.000000e+00> : vector<8x128xf32>
    %57 = tpu.matmul %55, %56, %cst_37 {dimension_numbers = #tpu.dot_dimension_numbers<[1], [0], [0], [1], [0, 0, 1, 1], [], []>} : vector<8x256xbf16>, vector<256x128xbf16>, vector<8x128xf32> -> vector<8x128xf32>
    %c0_38 = arith.constant 0 : index
    %c0_39 = arith.constant 0 : index
    %58 = vector.load %arg13[%c0_38, %c0_39] : memref<1x128xf32, #tpu.memory_space<vmem>>, vector<1x128xf32>
    %59 = vector.broadcast %58 : vector<1x128xf32> to vector<8x128xf32>
    %60 = arith.addf %57, %59 : vector<8x128xf32>
    %cst_40 = arith.constant 0.000000e+00 : f32
    %61 = vector.broadcast %cst_40 : f32 to vector<8x128xf32>
    %62 = arith.cmpf ogt, %60, %61 : vector<8x128xf32>
    %cst_41 = arith.constant 0.00999999977 : f32
    %63 = vector.broadcast %cst_41 : f32 to vector<8x128xf32>
    %64 = arith.mulf %63, %60 : vector<8x128xf32>
    %65 = arith.select %62, %60, %64 : vector<8x128xi1>, vector<8x128xf32>
    %66 = arith.truncf %65 : vector<8x128xf32> to vector<8x128xbf16>
    %c0_42 = arith.constant 0 : index
    %c0_43 = arith.constant 0 : index
    %67 = vector.load %arg14[%c0_42, %c0_43] : memref<128x128xbf16, #tpu.memory_space<vmem>>, vector<128x128xbf16>
    %cst_44 = arith.constant dense<0.000000e+00> : vector<8x128xf32>
    %68 = tpu.matmul %66, %67, %cst_44 {dimension_numbers = #tpu.dot_dimension_numbers<[1], [0], [0], [1], [0, 0, 1, 1], [], []>} : vector<8x128xbf16>, vector<128x128xbf16>, vector<8x128xf32> -> vector<8x128xf32>
    %c0_45 = arith.constant 0 : index
    %c0_46 = arith.constant 0 : index
    %69 = vector.load %arg15[%c0_45, %c0_46] : memref<1x128xf32, #tpu.memory_space<vmem>>, vector<1x128xf32>
    %70 = vector.broadcast %69 : vector<1x128xf32> to vector<8x128xf32>
    %71 = arith.addf %68, %70 : vector<8x128xf32>
    %c0_47 = arith.constant 0 : index
    %c0_48 = arith.constant 0 : index
    %72 = vector.load %arg16[%c0_47, %c0_48] : memref<8x128xf32, #tpu.memory_space<vmem>>, vector<8x128xf32>
    tpu.vector_store %arg16[%c0_47, %c0_48], %71 {strides = array<i32>} : memref<8x128xf32, #tpu.memory_space<vmem>>, vector<8x128xf32>,
    return
  }
  func.func @transform_0(%arg0: i32) -> (i32, i32) {
    %c0_i32 = arith.constant 0 : i32
    %c0_i32_0 = arith.constant 0 : i32
    return %arg0, %c0_i32 : i32, i32
  }
  func.func @transform_1(%arg0: i32) -> (i32, i32) {
    %c0_i32 = arith.constant 0 : i32
    %c0_i32_0 = arith.constant 0 : i32
    %c0_i32_1 = arith.constant 0 : i32
    return %c0_i32, %c0_i32_0 : i32, i32
  }
  func.func @transform_2(%arg0: i32) -> (i32, i32) {
    %c0_i32 = arith.constant 0 : i32
    %c0_i32_0 = arith.constant 0 : i32
    %c0_i32_1 = arith.constant 0 : i32
    return %c0_i32, %c0_i32_0 : i32, i32
  }
  func.func @transform_3(%arg0: i32) -> (i32, i32) {
    %c0_i32 = arith.constant 0 : i32
    %c0_i32_0 = arith.constant 0 : i32
    %c0_i32_1 = arith.constant 0 : i32
    return %c0_i32, %c0_i32_0 : i32, i32
  }
  func.func @transform_4(%arg0: i32) -> (i32, i32) {
    %c0_i32 = arith.constant 0 : i32
    %c0_i32_0 = arith.constant 0 : i32
    %c0_i32_1 = arith.constant 0 : i32
    return %c0_i32, %c0_i32_0 : i32, i32
  }
  func.func @transform_5(%arg0: i32) -> (i32, i32) {
    %c0_i32 = arith.constant 0 : i32
    %c0_i32_0 = arith.constant 0 : i32
    %c0_i32_1 = arith.constant 0 : i32
    return %c0_i32, %c0_i32_0 : i32, i32
  }
  func.func @transform_6(%arg0: i32) -> (i32, i32) {
    %c0_i32 = arith.constant 0 : i32
    %c0_i32_0 = arith.constant 0 : i32
    %c0_i32_1 = arith.constant 0 : i32
    return %c0_i32, %c0_i32_0 : i32, i32
  }
  func.func @transform_7(%arg0: i32) -> (i32, i32) {
    %c0_i32 = arith.constant 0 : i32
    %c0_i32_0 = arith.constant 0 : i32
    %c0_i32_1 = arith.constant 0 : i32
    return %c0_i32, %c0_i32_0 : i32, i32
  }
  func.func @transform_8(%arg0: i32) -> (i32, i32) {
    %c0_i32 = arith.constant 0 : i32
    %c0_i32_0 = arith.constant 0 : i32
    %c0_i32_1 = arith.constant 0 : i32
    return %c0_i32, %c0_i32_0 : i32, i32
  }
  func.func @transform_9(%arg0: i32) -> (i32, i32) {
    %c0_i32 = arith.constant 0 : i32
    %c0_i32_0 = arith.constant 0 : i32
    %c0_i32_1 = arith.constant 0 : i32
    return %c0_i32, %c0_i32_0 : i32, i32
  }
  func.func @transform_10(%arg0: i32) -> (i32, i32) {
    %c0_i32 = arith.constant 0 : i32
    %c0_i32_0 = arith.constant 0 : i32
    %c0_i32_1 = arith.constant 0 : i32
    return %c0_i32, %c0_i32_0 : i32, i32
  }
  func.func @transform_11(%arg0: i32) -> (i32, i32) {
    %c0_i32 = arith.constant 0 : i32
    %c0_i32_0 = arith.constant 0 : i32
    %c0_i32_1 = arith.constant 0 : i32
    return %c0_i32, %c0_i32_0 : i32, i32
  }
  func.func @transform_12(%arg0: i32) -> (i32, i32) {
    %c0_i32 = arith.constant 0 : i32
    %c0_i32_0 = arith.constant 0 : i32
    %c0_i32_1 = arith.constant 0 : i32
    return %c0_i32, %c0_i32_0 : i32, i32
  }
  func.func @transform_13(%arg0: i32) -> (i32, i32) {
    %c0_i32 = arith.constant 0 : i32
    %c0_i32_0 = arith.constant 0 : i32
    %c0_i32_1 = arith.constant 0 : i32
    return %c0_i32, %c0_i32_0 : i32, i32
  }
  func.func @transform_14(%arg0: i32) -> (i32, i32) {
    %c0_i32 = arith.constant 0 : i32
    %c0_i32_0 = arith.constant 0 : i32
    %c0_i32_1 = arith.constant 0 : i32
    return %c0_i32, %c0_i32_0 : i32, i32
  }
  func.func @transform_15(%arg0: i32) -> (i32, i32) {
    %c0_i32 = arith.constant 0 : i32
    %c0_i32_0 = arith.constant 0 : i32
    return %arg0, %c0_i32 : i32, i32
  }
}

</mosaic_0001>

<bundles_post_ra>
// kernel: thai_life_forward.1
= control target key start
LH: loop header
LB: loop body
LE: loop exit
PB: predicated region body
PF: predicated region fallthrough
CT: control target
= control target key end

     0   :  { %s3621_s18 = smov 0   ;;  %s4461_s0 = inlined_call_operand.vmem [shape: bf16[16,384], index: 0, kind: input, shape index: {}]   ;;  %s4462_s1 = inlined_call_operand.vmem [shape: bf16[384,300], index: 1, kind: input, shape index: {}]   ;;  %s4463_s2 = inlined_call_operand.vmem [shape: f32[1,300], index: 2, kind: input, shape index: {}]   ;;  %s4464_s3 = inlined_call_operand.vmem [shape: bf16[300,200], index: 3, kind: input, shape index: {}]   ;;  %s4465_s4 = inlined_call_operand.vmem [shape: f32[1,200], index: 4, kind: input, shape index: {}]   ;;  %s4466_s5 = inlined_call_operand.vmem [shape: bf16[200,128], index: 5, kind: input, shape index: {}]   ;;  %s4467_s6 = inlined_call_operand.vmem [shape: f32[1,128], index: 6, kind: input, shape index: {}]   ;;  %s4468_s7 = inlined_call_operand.vmem [shape: bf16[128,512], index: 7, kind: input, shape index: {}]   ;;  %s4469_s8 = inlined_call_operand.vmem [shape: f32[1,512], index: 8, kind: input, shape index: {}]   ;;  %s4470_s9 = inlined_call_operand.vmem [shape: bf16[512,256], index: 9, kind: input, shape index: {}]   ;;  %s4471_s10 = inlined_call_operand.vmem [shape: f32[1,256], index: 10, kind: input, shape index: {}]   ;;  %s4472_s11 = inlined_call_operand.vmem [shape: bf16[256,128], index: 11, kind: input, shape index: {}]   ;;  %s4473_s12 = inlined_call_operand.vmem [shape: f32[1,128], index: 12, kind: input, shape index: {}]   ;;  %s4474_s13 = inlined_call_operand.vmem [shape: bf16[128,128], index: 13, kind: input, shape index: {}]   ;;  %s4475_s14 = inlined_call_operand.vmem [shape: f32[1,128], index: 14, kind: input, shape index: {}]   ;;  %s4476_s15 = inlined_call_operand.vmem [shape: f32[16,128], index: 15, kind: output, shape index: {}]  }
   0x1 LB: > { %s2818_s19 = sadd.s32 4294967295, %s3536_s18   ;;  %p2822_p0 = scmp.ge.s32.totalorder %s3536_s18, 1  ;;  %s3536_s18 = sphi %s3621_s18, %s25_s18  }
   0x2   : > { %p437_p1 = scmp.lt.s32.totalorder %s3536_s18, 3 }
   0x4   : > { %p438_p2 = pnand %p2822_p0, %p437_p1 }
   0x5   : > { %p484_p3 = scmp.lt.s32.totalorder (!%p438_p2), %s2818_s19, 1 }
   0x6   : > { %441 = sbr.rel (%p438_p2) target bundleno = 1522 (0x5f2), region = 80 }
   0xb   : > { %v3193_v0 = vld [vmem:[%s4462_s1 + $0xac] ss:$12 sps:$4 sm:$0xff]   ;;  %v3195_v1 = vld [vmem:[%s4462_s1 + $0xa8] ss:$12 sps:$4 sm:$0xff]   ;;  %v3538_v2 = vmov 0   ;;  %s4478_s19 = smov (!%p484_p3, %s2818_s19), 1 }
   0xc   : > { %1077 = vmatprep.mubr.bf16.mxu1 %v3538_v2  ;;  %1004 = vmatprep.subr.bf16.mxu0 %v3193_v0  ;;  %v3196_v3 = vld [vmem:[%s4462_s1 + $0x94] ss:$12 sps:$4 sm:$0xff]   ;;  %v3198_v4 = vld [vmem:[%s4462_s1 + $0x90] ss:$12 sps:$4 sm:$0xff]   ;;  %v3201_v6 = vld [vmem:[%s4462_s1 + $0x78] ss:$12 sps:$4 sm:$0xff]  }
   0xd   : > { %1005 = vmatpush1.bf16.msra.mxu0 %v3195_v1  ;;  %v3199_v5 = vld [vmem:[%s4462_s1 + $0x7c] ss:$12 sps:$4 sm:$0xff]   ;;  %v3202_v7 = vld [vmem:[%s4462_s1 + $0x64] ss:$12 sps:$4 sm:$0xff]   ;;  %v3210_v8 = vld [vmem:[%s4462_s1 + $0x22c] ss:$12 sps:$4 sm:$0xff]  }
   0xe   : > { %1006 = vmatprep.subr.bf16.mxu0 %v3196_v3  ;;  %v3213_v9 = vld [vmem:[%s4462_s1 + $0x228] ss:$12 sps:$4 sm:$0xff]   ;;  %1045 = vmatprep.subr.bf16.mxu1 %v3210_v8  ;;  %v3204_v10 = vld [vmem:[%s4462_s1 + $0x60] ss:$12 sps:$4 sm:$0xff]   ;;  %v3219_v12 = vld [vmem:[%s4462_s1 + $0x210] ss:$12 sps:$4 sm:$0xff]  }
   0xf   : > { %1046 = vmatpush1.bf16.msra.mxu1 %v3213_v9  ;;  %v3216_v11 = vld [vmem:[%s4462_s1 + $0x214] ss:$12 sps:$4 sm:$0xff]   ;;  %v3205_v13 = vld [vmem:[%s4462_s1 + $0x4c] ss:$12 sps:$4 sm:$0xff]   ;;  %v3222_v14 = vld [vmem:[%s4462_s1 + $0x1fc] ss:$12 sps:$4 sm:$0xff]  }
  0x10   : > { %1047 = vmatprep.subr.bf16.mxu1 %v3216_v11  ;;  %v3207_v15 = vld [vmem:[%s4462_s1 + $0x48] ss:$12 sps:$4 sm:$0xff]   ;;  %v3225_v16 = vld [vmem:[%s4462_s1 + $0x1f8] ss:$12 sps:$4 sm:$0xff]   ;;  %v3212_v19 = vld [vmem:[%s4462_s1 + $0x30] ss:$12 sps:$4 sm:$0xff]  }
  0x11   : > { %1007 = vmatpush1.bf16.msra.mxu0 %v3198_v4  ;;  %v3208_v17 = vld [vmem:[%s4462_s1 + $0x34] ss:$12 sps:$4 sm:$0xff]   ;;  %v3228_v18 = vld [vmem:[%s4462_s1 + $0x1e4] ss:$12 sps:$4 sm:$0xff]   ;;  %v3214_v20 = vld [vmem:[%s4462_s1 + $0x1c] ss:$12 sps:$4 sm:$0xff]  }
  0x12   : > { %1008 = vmatprep.subr.bf16.mxu0 %v3199_v5  ;;  %v3231_v21 = vld [vmem:[%s4462_s1 + $0x1e0] ss:$12 sps:$4 sm:$0xff]   ;;  %v3218_v23 = vld [vmem:[%s4462_s1 + $0x18] ss:$12 sps:$4 sm:$0xff]   ;;  %v3237_v24 = vld [vmem:[%s4462_s1 + $0x1c8] ss:$12 sps:$4 sm:$0xff]  }
  0x13   : > { %1048 = vmatpush1.bf16.msra.mxu1 %v3219_v12  ;;  %v3234_v22 = vld [vmem:[%s4462_s1 + $0x1cc] ss:$12 sps:$4 sm:$0xff]   ;;  %v3220_v25 = vld [vmem:[%s4462_s1 + $0x4] ss:$12 sps:$4 sm:$0xff]   ;;  %v3240_v26 = vld [vmem:[%s4462_s1 + $0x1b4] ss:$12 sps:$4 sm:$0xff]  }
  0x14   : > { %1049 = vmatprep.subr.bf16.mxu1 %v3222_v14  ;;  %s3181_s20 = smul.u32 12, %s4478_s19  ;;  %v3224_v27 = vld [vmem:[%s4462_s1] ss:$12 sps:$4 sm:$0xff]   ;;  %v3243_v29 = vld [vmem:[%s4462_s1 + $0x1b0] ss:$12 sps:$4 sm:$0xff]   ;;  %v3539_v5 = vmov 0.0  }
  0x15   : > { %1009 = vmatpush1.bf16.msra.mxu0 %v3201_v6  ;;  %v3226_v28 = vld [vmem:[%s4462_s1 + $0x16c] ss:$12 sps:$4 sm:$0xff]   ;;  %v3246_v30 = vld [vmem:[%s4462_s1 + $0x19c] ss:$12 sps:$4 sm:$0xff]   ;;  %v3232_v32 = vld [vmem:[%s4462_s1 + $0x154] ss:$12 sps:$4 sm:$0xff]  }
  0x16   : > { %1010 = vmatprep.subr.bf16.mxu0 %v3202_v7  ;;  %s488_s16 = scalar_lea.vmem %s4461_s0, %s3181_s20  ;;  %v3230_v31 = vld [vmem:[%s4462_s1 + $0x168] ss:$12 sps:$4 sm:$0xff]   ;;  %v3249_v33 = vld [vmem:[%s4462_s1 + $0x198] ss:$12 sps:$4 sm:$0xff]   ;;  %v3236_v35 = vld [vmem:[%s4462_s1 + $0x150] ss:$12 sps:$4 sm:$0xff]  }
  0x17   : > { %1050 = vmatpush1.bf16.msra.mxu1 %v3225_v16  ;;  %v3252_v34 = vld [vmem:[%s4462_s1 + $0x184] ss:$12 sps:$4 sm:$0xff]   ;;  %v3238_v36 = vld [vmem:[%s4462_s1 + $0x13c] ss:$12 sps:$4 sm:$0xff]   ;;  %v3255_v37 = vld [vmem:[%s4462_s1 + $0x180] ss:$12 sps:$4 sm:$0xff]  }
  0x18   : > { %1051 = vmatprep.subr.bf16.mxu1 %v3228_v18  ;;  %v3258_v38 = vld [vmem:[%s4462_s1 + $0x170] ss:$12 sps:$4 sm:$0xff]   ;;  %v3242_v39 = vld [vmem:[%s4462_s1 + $0x138] ss:$12 sps:$4 sm:$0xff]   ;;  %v3760_v41 = vld [vmem:[%s488_s16 + $0x8] ss:$0 sps:$4 sm:$0xff]  }
  0x19   : > { %1011 = vmatpush1.bf16.msra.mxu0 %v3204_v10  ;;  %v3244_v40 = vld [vmem:[%s4462_s1 + $0x124] ss:$12 sps:$4 sm:$0xff]   ;;  %v3248_v46 = vld [vmem:[%s4462_s1 + $0x120] ss:$12 sps:$4 sm:$0xff]   ;;  %v3254_v50 = vld [vmem:[%s4462_s1 + $0x108] ss:$12 sps:$4 sm:$0xff]  }
  0x1a   : > { %1012 = vmatprep.subr.bf16.mxu0 %v3205_v13  ;;  %v494_v42 = vld [vmem:[%s488_s16] sm:$0xff]  ;;  %v3261_v43 = vld [vmem:[%s4462_s1 + $0xb0] ss:$12 sps:$4 sm:$0xff]   ;;  %v3250_v47 = vld [vmem:[%s4462_s1 + $0x10c] ss:$12 sps:$4 sm:$0xff]   ;;  %vm3540_vm0 = vmmov 0  }
  0x1b   : > { %1052 = vmatpush1.bf16.msra.mxu1 %v3231_v21  ;;  %v2826_v44 = vcombine.high %v494_v42, %v494_v42  ;;  %v3264_v45 = vld [vmem:[%s4462_s1 + $0x158] ss:$12 sps:$4 sm:$0xff]   ;;  %v3269_v49 = vld [vmem:[%s4462_s1 + $0x140] ss:$12 sps:$4 sm:$0xff]   ;;  %v3274_v53 = vld [vmem:[%s4462_s1 + $0x128] ss:$12 sps:$4 sm:$0xff]   ;;  %v2825_v1 = vcombine.low %v494_v42, %v494_v42 }
  0x1c   : > { %1053 = vmatprep.subr.bf16.mxu1 %v3234_v22  ;;  %v3266_v48 = vld [vmem:[%s4462_s1 + $0x98] ss:$12 sps:$4 sm:$0xff]   ;;  %v3256_v51 = vld [vmem:[%s4462_s1 + $0xf4] ss:$12 sps:$4 sm:$0xff]   ;;  %v3259_v54 = vld [vmem:[%s4462_s1 + $0xf0] ss:$12 sps:$4 sm:$0xff]  }
  0x1d   : > { %1013 = vmatpush1.bf16.msra.mxu0 %v3207_v15  ;;  %1036 = vmatprep.mubr.bf16.mxu0 %v2826_v44  ;;  %v3271_v52 = vld [vmem:[%s4462_s1 + $0x80] ss:$12 sps:$4 sm:$0xff]   ;;  %v3262_v55 = vld [vmem:[%s4462_s1 + $0xdc] ss:$12 sps:$4 sm:$0xff]   ;;  %v3265_v58 = vld [vmem:[%s4462_s1 + $0xd8] ss:$12 sps:$4 sm:$0xff]  }
  0x1e   : > { %1014 = vmatprep.subr.bf16.mxu0 %v3208_v17  ;;  %v3275_v56 = vld [vmem:[%s4462_s1 + $0x68] ss:$12 sps:$4 sm:$0xff]   ;;  %v3277_v57 = vld [vmem:[%s4462_s1 + $0x110] ss:$12 sps:$4 sm:$0xff]   ;;  %v3280_v61 = vld [vmem:[%s4462_s1 + $0xf8] ss:$12 sps:$4 sm:$0xff]  }
  0x1f   : > { %1054 = vmatpush1.bf16.msra.mxu1 %v3237_v24  ;;  %v3267_v59 = vld [vmem:[%s4462_s1 + $0xc4] ss:$12 sps:$4 sm:$0xff]   ;;  %v3270_v62 = vld [vmem:[%s4462_s1 + $0xc0] ss:$12 sps:$4 sm:$0xff]   ;;  %v3286_v6 = vld [vmem:[%s4462_s1 + $0xc8] ss:$12 sps:$4 sm:$0xff]  }
  0x20   : > { %1055 = vmatprep.subr.bf16.mxu1 %v3240_v26  ;;  %v3278_v60 = vld [vmem:[%s4462_s1 + $0x50] ss:$12 sps:$4 sm:$0xff]   ;;  %v3281_v63 = vld [vmem:[%s4462_s1 + $0x38] ss:$12 sps:$4 sm:$0xff]   ;;  %v3283_v0 = vld [vmem:[%s4462_s1 + $0xe0] ss:$12 sps:$4 sm:$0xff]  }
  0x21   : > { %1015 = vmatpush1.bf16.msra.mxu0 %v3212_v19  ;;  %v3276_v3 = vld [vmem:[%s4462_s1 + $0x230] ss:$12 sps:$4 sm:$0xff]   ;;  %v3284_v4 = vld [vmem:[%s4462_s1 + $0x20] ss:$12 sps:$4 sm:$0xff]   ;;  %v3279_v7 = vld [vmem:[%s4462_s1 + $0x218] ss:$12 sps:$4 sm:$0xff]  }
  0x22   : > { %1016 = vmatprep.subr.bf16.mxu0 %v3214_v20  ;;  %v3287_v8 = vld [vmem:[%s4462_s1 + $0x8] ss:$12 sps:$4 sm:$0xff]   ;;  %v3282_v10 = vld [vmem:[%s4462_s1 + $0x200] ss:$12 sps:$4 sm:$0xff]   ;;  %v3292_v11 = vld [vmem:[%s4464_s3 + $0x70] ss:$8 sps:$4 sm:$0xff]  }
  0x23   : > { %1056 = vmatpush1.bf16.msra.mxu1 %v3243_v29  ;;  %v3294_v9 = vld [vmem:[%s4464_s3 + $0x74] ss:$8 sps:$4 sm:$0xff]   ;;  %v3297_v12 = vld [vmem:[%s4464_s3 + $0x64] ss:$8 sps:$4 sm:$0xff]   ;;  %v3295_v14 = vld [vmem:[%s4464_s3 + $0x60] ss:$8 sps:$4 sm:$0xff]  }
  0x24   : > { %1057 = vmatprep.subr.bf16.mxu1 %v3246_v30  ;;  %v3285_v13 = vld [vmem:[%s4462_s1 + $0x1e8] ss:$12 sps:$4 sm:$0xff]   ;;  %v3288_v16 = vld [vmem:[%s4462_s1 + $0x1d0] ss:$12 sps:$4 sm:$0xff]   ;;  %v3303_v18 = vld [vmem:[%s4464_s3 + $0x44] ss:$8 sps:$4 sm:$0xff]  }
  0x25   : > { %1017 = vmatpush1.bf16.msra.mxu0 %v3218_v23  ;;  %v3300_v15 = vld [vmem:[%s4464_s3 + $0x54] ss:$8 sps:$4 sm:$0xff]   ;;  %v3298_v17 = vld [vmem:[%s4464_s3 + $0x50] ss:$8 sps:$4 sm:$0xff]   ;;  %v3301_v20 = vld [vmem:[%s4464_s3 + $0x40] ss:$8 sps:$4 sm:$0xff]  }
  0x26   : > { %1018 = vmatprep.subr.bf16.mxu0 %v3220_v25  ;;  %v3289_v19 = vld [vmem:[%s4462_s1 + $0x1b8] ss:$12 sps:$4 sm:$0xff]   ;;  %v3306_v21 = vld [vmem:[%s4464_s3 + $0x34] ss:$8 sps:$4 sm:$0xff]   ;;  %v3290_v22 = vld [vmem:[%s4462_s1 + $0x1a0] ss:$12 sps:$4 sm:$0xff]  }
  0x27   : > { %1058 = vmatpush1.bf16.msra.mxu1 %v3249_v33  ;;  %v3304_v23 = vld [vmem:[%s4464_s3 + $0x30] ss:$8 sps:$4 sm:$0xff]   ;;  %v3309_v24 = vld [vmem:[%s4464_s3 + $0x24] ss:$8 sps:$4 sm:$0xff]   ;;  %v3291_v25 = vld [vmem:[%s4462_s1 + $0x188] ss:$12 sps:$4 sm:$0xff]  }
  0x28   : > { %1059 = vmatprep.subr.bf16.mxu1 %v3252_v34  ;;  %v3307_v26 = vld [vmem:[%s4464_s3 + $0x20] ss:$8 sps:$4 sm:$0xff]   ;;  %v3315_v29 = vld [vmem:[%s4464_s3 + $0x4] ss:$8 sps:$4 sm:$0xff]   ;;  %vm1420_vm1 = vcmask 1045504   ;;  %vm1416_vm5 = vcmask 359424  }
  0x29   : > { %1019 = vmatpush1.bf16.msra.mxu0 %v3224_v27  ;;  %v3312_v27 = vld [vmem:[%s4464_s3 + $0x14] ss:$8 sps:$4 sm:$0xff]   ;;  %v3313_v30 = vld [vmem:[%s4464_s3] ss:$8 sps:$4 sm:$0xff]   ;;  %v3321_v33 = vld [vmem:[%s4464_s3 + $0xe4] ss:$8 sps:$4 sm:$0xff]  }
  0x2a   : > { %1020 = vmatprep.subr.bf16.mxu0 %v3226_v28  ;;  %v3310_v28 = vld [vmem:[%s4464_s3 + $0x10] ss:$8 sps:$4 sm:$0xff]   ;;  %v3319_v34 = vld [vmem:[%s4464_s3 + $0xe0] ss:$8 sps:$4 sm:$0xff]   ;;  %vm1628_vm6 = vcmask 1043456   ;;  %vm1624_vm9 = vcmask 588800  }
  0x2b   : > { %1060 = vmatpush1.bf16.msra.mxu1 %v3255_v37  ;;  %v3327_v37 = vld [vmem:[%s4464_s3 + $0xc4] ss:$8 sps:$4 sm:$0xff]   ;;  %v3331_v42 = vld [vmem:[%s4464_s3 + $0xa0] ss:$8 sps:$4 sm:$0xff]   ;;  %s2824_s29 = sshll.u32 %s4478_s19, 3 }
  0x2c   : > { %3079 = vmatprep.subr.bf16.mxu1 %v3258_v38  ;;  %v3325_v38 = vld [vmem:[%s4464_s3 + $0xc0] ss:$8 sps:$4 sm:$0xff]   ;;  %s492_s16 = scalar_lea.vmem %s4476_s15, %s2824_s29 }
  0x2d   : > { %1021 = vmatpush2.bf16.msra.mxu0 %v3230_v31  ;;  %v3318_v31 = vld [vmem:[%s4464_s3 + $0xf4] ss:$8 sps:$4 sm:$0xff]  }
  0x2e   : > { %1022 = vmatprep.subr.bf16.mxu0 %v3232_v32  ;;  %1078 = vmatmul.mubr.bf16.vlgmr.msra.gmra.mxu1 %v3760_v41  ;;  %v3316_v32 = vld [vmem:[%s4464_s3 + $0xf0] ss:$8 sps:$4 sm:$0xff]  }
  0x2f   : > { %3080 = vmatpush3.bf16.msra.mxu1 %v3261_v43  ;;  %1118 = vmatprep.mubr.bf16.mxu1 %v2826_v44  ;;  %v3336_v43 = vld [vmem:[%s4464_s3 + $0x94] ss:$8 sps:$4 sm:$0xff]   ;;  %v3334_v44 = vld [vmem:[%s4464_s3 + $0x90] ss:$8 sps:$4 sm:$0xff]  }
  0x30   : > { %3081 = vmatprep.subr.bf16.mxu1 %v3264_v45  ;;  %v3339_v45 = vld [vmem:[%s4464_s3 + $0x84] ss:$8 sps:$4 sm:$0xff]  }
  0x31   : > { %1023 = vmatpush2.bf16.msra.mxu0 %v3236_v35  ;;  %v3324_v35 = vld [vmem:[%s4464_s3 + $0xd4] ss:$8 sps:$4 sm:$0xff]  }
  0x32   : > { %1024 = vmatprep.subr.bf16.mxu0 %v3238_v36  ;;  %v3322_v36 = vld [vmem:[%s4464_s3 + $0xd0] ss:$8 sps:$4 sm:$0xff]  }
  0x33   : > { %3082 = vmatpush3.bf16.msra.mxu1 %v3266_v48  ;;  %v3349_v48 = vld [vmem:[%s4466_s5 + $0x38] sm:$0xff]  }
  0x34   : > { %3083 = vmatprep.subr.bf16.mxu1 %v3269_v49  ;;  %v3350_v49 = vld [vmem:[%s4466_s5 + $0x30] sm:$0xff]  }
  0x35   : > { %1025 = vmatpush2.bf16.msra.mxu0 %v3242_v39  ;;  %v3330_v39 = vld [vmem:[%s4464_s3 + $0xb4] ss:$8 sps:$4 sm:$0xff]  }
  0x36   : > { %1026 = vmatprep.subr.bf16.mxu0 %v3244_v40  ;;  %v3328_v40 = vld [vmem:[%s4464_s3 + $0xb0] ss:$8 sps:$4 sm:$0xff]  }
  0x37   : > { %3084 = vmatpush3.bf16.msra.mxu1 %v3271_v52 }
  0x38   : > { %3085 = vmatprep.subr.bf16.mxu1 %v3274_v53 }
  0x39   : > { %1027 = vmatpush2.bf16.msra.mxu0 %v3248_v46  ;;  %v3337_v46 = vld [vmem:[%s4464_s3 + $0x80] ss:$8 sps:$4 sm:$0xff]  }
  0x3a   : > { %1028 = vmatprep.subr.bf16.mxu0 %v3250_v47  ;;  %v3340_v47 = vld [vmem:[%s4464_s3 + $0x124] ss:$8 sps:$4 sm:$0x3f]  }
  0x3b   : > { %3086 = vmatpush3.bf16.msra.mxu1 %v3275_v56  ;;  %v594_v56 = vlaneseq }
  0x3c   : > { %3087 = vmatprep.subr.bf16.mxu1 %v3277_v57 }
  0x3d   : > { %1029 = vmatpush2.bf16.msra.mxu0 %v3254_v50  ;;  %v3351_v50 = vld [vmem:[%s4466_s5 + $0x28] sm:$0xff]   ;;  %v3987_v57 = vshrl.u32 %v594_v56, 7  ;;  %v3388_v56 = vld [vmem:[%s4468_s7 + $0x64] ss:$16 sps:$4 sm:$0xff]  }
  0x3e   : > { %1030 = vmatprep.subr.bf16.mxu0 %v3256_v51  ;;  %v3352_v51 = vld [vmem:[%s4466_s5 + $0x20] sm:$0xff]  }
  0x3f   : > { %3088 = vmatpush3.bf16.msra.mxu1 %v3278_v60  ;;  %v3996_v60 = vsub.s32 1, %v3987_v57 }
  0x40   : > { %3089 = vmatprep.subr.bf16.mxu1 %v3280_v61 }
  0x41   : > { %1031 = vmatpush2.bf16.msra.mxu0 %v3259_v54 }
  0x42   : > { %1032 = vmatprep.subr.bf16.mxu0 %v3262_v55 }
  0x43   : > { %3090 = vmatpush3.bf16.msra.mxu1 %v3281_v63 }
  0x44   : > { %3091 = vmatprep.subr.bf16.mxu1 %v3283_v0 }
  0x45   : > { %1033 = vmatpush2.bf16.msra.mxu0 %v3265_v58  ;;  %v3990_v58 = vsub.s32 0, %v3987_v57 }
  0x46   : > { %1034 = vmatprep.subr.bf16.mxu0 %v3267_v59  ;;  %v592_v59 = vld [vmem:[%s4463_s2] sm:$0x7] }
  0x47   : > { %3092 = vmatpush3.bf16.msra.mxu1 %v3284_v4  ;;  %v597_v61 = vrot.slane %v592_v59, %v3990_v58 }
  0x48   : > { %3093 = vmatprep.subr.bf16.mxu1 %v3286_v6 }
  0x49   : > { %1035 = vmatpush2.bf16.msra.mxu0 %v3270_v62  ;;  %v601_v62 = vrot.slane %v592_v59, %v3996_v60 }
  0x4a   : > { %3141 = vmatprep.subr.bf16.mxu0 %v3539_v5 }
  0x4b   : > { %3094 = vmatpush3.bf16.msra.mxu1 %v3287_v8 }
  0x4c   : > { %1037 = vmatmul.mubr.bf16.vlgmr.msra.gmra.mxu0 %v2825_v1  ;;  %1427 = vmatprep.subr.bf16.mxu1 %v3294_v9 }
  0x4d   : > { %3142 = vmatpush3.bf16.msra.mxu0 %v3276_v3  ;;  %3157 = vmatprep.mubr.msk.bf16.mxu0 %vm3540_vm0, %v3539_v5 }
  0x4e   : > { %3143 = vmatprep.subr.bf16.mxu0 %v3539_v5  ;;  %1119 = vmatmul.mubr.bf16.vlgmr.msra.gmra.mxu1 %v2825_v1 }
  0x4f   : > { %1428 = vmatpush1.bf16.msra.mxu1 %v3292_v11  ;;  %v3342_v11 = vld [vmem:[%s4464_s3 + $0x120] ss:$8 sps:$4 sm:$0x3f]  }
  0x50   : > { %1429 = vmatprep.subr.bf16.mxu1 %v3297_v12 }
  0x51   : > { %3144 = vmatpush3.bf16.msra.mxu0 %v3279_v7 }
  0x52   : > { %3145 = vmatprep.subr.bf16.mxu0 %v3539_v5 }
  0x53   : > { %1430 = vmatpush1.bf16.msra.mxu1 %v3295_v14 }
  0x54   : > { %1431 = vmatprep.subr.bf16.mxu1 %v3300_v15 }
  0x55   : > { %3146 = vmatpush3.bf16.msra.mxu0 %v3282_v10 }
  0x56   : > { %3147 = vmatprep.subr.bf16.mxu0 %v3539_v5 }
  0x57   : > { %1432 = vmatpush1.bf16.msra.mxu1 %v3298_v17 }
  0x58   : > { %1433 = vmatprep.subr.bf16.mxu1 %v3303_v18  ;;  %v1422_v18 = vsel %vm1420_vm1, %v3342_v11, 0 }
  0x59   : > { %3148 = vmatpush3.bf16.msra.mxu0 %v3285_v13 }
  0x5a   : > { %3149 = vmatprep.subr.bf16.mxu0 %v3539_v5 }
  0x5b   : > { %1434 = vmatpush1.bf16.msra.mxu1 %v3301_v20 }
  0x5c   : > { %1435 = vmatprep.subr.bf16.mxu1 %v3306_v21 }
  0x5d   : > { %3150 = vmatpush3.bf16.msra.mxu0 %v3288_v16 }
  0x5e   : > { %3151 = vmatprep.subr.bf16.mxu0 %v3539_v5 }
  0x5f   : > { %1436 = vmatpush1.bf16.msra.mxu1 %v3304_v23  ;;  %v3348_v23 = vld [vmem:[%s4464_s3 + $0x104] ss:$8 sps:$4 sm:$0xff]  }
  0x60   : > { %1437 = vmatprep.subr.bf16.mxu1 %v3309_v24  ;;  %v3346_v24 = vld [vmem:[%s4464_s3 + $0x100] ss:$8 sps:$4 sm:$0xff]  }
  0x61   : > { %3152 = vmatpush3.bf16.msra.mxu0 %v3289_v19  ;;  %v3345_v19 = vld [vmem:[%s4464_s3 + $0x114] ss:$8 sps:$4 sm:$0xff]  }
  0x62   : > { %3153 = vmatprep.subr.bf16.mxu0 %v3539_v5 }
  0x63   : > { %1438 = vmatpush1.bf16.msra.mxu1 %v3307_v26 }
  0x64   : > { %1439 = vmatprep.subr.bf16.mxu1 %v3312_v27 }
  0x65   : > { %3154 = vmatpush3.bf16.msra.mxu0 %v3290_v22  ;;  %v3343_v22 = vld [vmem:[%s4464_s3 + $0x110] ss:$8 sps:$4 sm:$0xff]  }
  0x66   : > { %3155 = vmatprep.subr.bf16.mxu0 %v3539_v5 }
  0x67   : > { %1440 = vmatpush1.bf16.msra.mxu1 %v3310_v28 }
  0x68   : > { %1441 = vmatprep.subr.bf16.mxu1 %v3315_v29 }
  0x69   : > { %3156 = vmatpush3.bf16.msra.mxu0 %v3291_v25  ;;  %v604_v25 = vsub.s32 2, %v3987_v57 }
  0x6a   : > { %1632 = vmatprep.subr.bf16.mxu0 %v3538_v2 }
  0x6b   : > { %1442 = vmatpush1.bf16.msra.mxu1 %v3313_v30  ;;  %v605_v27 = vrot.slane %v592_v59, %v604_v25  ;;  %v3386_v59 = vld [vmem:[%s4468_s7 + $0x60] ss:$16 sps:$4 sm:$0xff]  }
  0x6c   : > { %3158 = vmatmul.mubr.bf16.vlgmr.msra.gmra.mxu0 %v3760_v41  ;;  %1443 = vmatprep.subr.bf16.mxu1 %v3318_v31  ;;  %v3333_v41 = vld [vmem:[%s4464_s3 + $0xa4] ss:$8 sps:$4 sm:$0xff]  }
  0x6d   : > { %1633 = vmatpush1.bf16.msra.mxu0 %v3349_v48  ;;  %v3364_v48 = vld [vmem:[%s4468_s7 + $0xe4] ss:$16 sps:$4 sm:$0xff]  }
  0x6e   : > { %1634 = vmatprep.subr.bf16.mxu0 %v3538_v2 }
  0x6f   : > { %1444 = vmatpush2.bf16.msra.mxu1 %v3316_v32 }
  0x70   : > { %1445 = vmatprep.subr.bf16.mxu1 %v3321_v33 }
  0x71   : > { %1635 = vmatpush1.bf16.msra.mxu0 %v3350_v49  ;;  %v3367_v49 = vld [vmem:[%s4468_s7 + $0xec] ss:$16 sps:$4 sm:$0xff]  }
  0x72   : > { %1636 = vmatprep.subr.bf16.mxu0 %v3538_v2 }
  0x73   : > { %1446 = vmatpush2.bf16.msra.mxu1 %v3319_v34 }
  0x74   : > { %1447 = vmatprep.subr.bf16.mxu1 %v3324_v35 }
  0x75   : > { %1637 = vmatpush1.bf16.msra.mxu0 %v3351_v50  ;;  %v3370_v50 = vld [vmem:[%s4468_s7 + $0xc4] ss:$16 sps:$4 sm:$0xff]  }
  0x76   : > { %1638 = vmatprep.subr.bf16.mxu0 %v3538_v2 }
  0x77   : > { %1448 = vmatpush2.bf16.msra.mxu1 %v3322_v36 }
  0x78   : > { %1449 = vmatprep.subr.bf16.mxu1 %v3327_v37  ;;  %v3353_v37 = vld [vmem:[%s4466_s5 + $0x18] sm:$0xff]  }
  0x79   : > { %1639 = vmatpush1.bf16.msra.mxu0 %v3352_v51  ;;  %v3368_v51 = vld [vmem:[%s4468_s7 + $0xc0] ss:$16 sps:$4 sm:$0xff]  }
  0x7a   : > { %1640 = vmatprep.subr.bf16.mxu0 %v3538_v2 }
  0x7b   : > { %1450 = vmatpush2.bf16.msra.mxu1 %v3325_v38  ;;  %v3354_v38 = vld [vmem:[%s4466_s5 + $0x10] sm:$0xff]  }
  0x7c   : > { %1451 = vmatprep.subr.bf16.mxu1 %v3330_v39  ;;  %v3355_v39 = vld [vmem:[%s4466_s5 + $0x8] sm:$0xff]  }
  0x7d   : > { %1641 = vmatpush1.bf16.msra.mxu0 %v3353_v37  ;;  %v3406_v37 = vld [vmem:[%s4468_s7 + $0x4] ss:$16 sps:$4 sm:$0xff]  }
  0x7e   : > { %1642 = vmatprep.subr.bf16.mxu0 %v3538_v2 }
  0x7f   : > { %1452 = vmatpush2.bf16.msra.mxu1 %v3328_v40  ;;  %v3356_v40 = vld [vmem:[%s4466_s5] sm:$0xff]  }
  0x80   : > { %1453 = vmatprep.subr.bf16.mxu1 %v3333_v41  ;;  %v3357_v41 = vld [vmem:[%s4466_s5 + $0x60] ss:$0 sps:$4 sm:$0xff]  }
  0x81   : > { %1643 = vmatpush1.bf16.msra.mxu0 %v3354_v38  ;;  %v3409_v38 = vld [vmem:[%s4468_s7 + $0xc] ss:$16 sps:$4 sm:$0xff]  }
  0x82   : > { %1644 = vmatprep.subr.bf16.mxu0 %v3538_v2 }
  0x83   : > { %1454 = vmatpush2.bf16.msra.mxu1 %v3331_v42  ;;  %v1630_v42 = vsel %vm1628_vm6, %v3357_v41, 0  ;;  %v3412_v41 = vld [vmem:[%s4470_s9 + $0x74] ss:$8 sps:$4 sm:$0xff]  }
  0x84   : > { %1455 = vmatprep.subr.bf16.mxu1 %v3336_v43  ;;  %v3358_v43 = vld [vmem:[%s4466_s5 + $0x58] sm:$0xff]  }
  0x85   : > { %1645 = vmatpush1.bf16.msra.mxu0 %v3355_v39  ;;  %v3404_v39 = vld [vmem:[%s4468_s7] ss:$16 sps:$4 sm:$0xff]  }
  0x86   : > { %1646 = vmatprep.subr.bf16.mxu0 %v3538_v2 }
  0x87   : > { %1456 = vmatpush2.bf16.msra.mxu1 %v3334_v44  ;;  %v3359_v44 = vld [vmem:[%s4466_s5 + $0x50] sm:$0xff]  }
  0x88   : > { %1457 = vmatprep.subr.bf16.mxu1 %v3339_v45  ;;  %v3360_v45 = vld [vmem:[%s4466_s5 + $0x48] sm:$0xff]  }
  0x89   : > { %1647 = vmatpush1.bf16.msra.mxu0 %v3356_v40  ;;  %v3407_v40 = vld [vmem:[%s4468_s7 + $0x8] ss:$16 sps:$4 sm:$0xff]  }
  0x8a   : > { %1654 = vmatprep.subr.bf16.mxu0 %v3538_v2 }
  0x8b   : > { %1458 = vmatpush2.bf16.msra.mxu1 %v3337_v46  ;;  %v3361_v46 = vld [vmem:[%s4466_s5 + $0x40] sm:$0xff]  }
  0x8c   : > { %2938 = vmatprep.subr.msk.bf16.mxu1 %vm1420_vm1, %v3340_v47  ;;  %v3362_v47 = vld [vmem:[%s4468_s7 + $0xe0] ss:$16 sps:$4 sm:$0xff]  }
  0x8d   : > { %1655 = vmatpush2.bf16.msra.mxu0 %v1630_v42  ;;  %v3415_v42 = vld [vmem:[%s4470_s9 + $0x174] ss:$8 sps:$4 sm:$0xff]  }
  0x8e   : > { %1656 = vmatprep.subr.bf16.mxu0 %v3538_v2 }
  0x91   : > { %1657 = vmatpush2.bf16.msra.mxu0 %v3358_v43  ;;  %v2940_v43 = vld [vmem:[%s4467_s6] ss:$0 sm:$0xff] }
  0x92   : > { %1658 = vmatprep.subr.bf16.mxu0 %v3538_v2 }
  0x95   : > { %1659 = vmatpush2.bf16.msra.mxu0 %v3359_v44 }
  0x96   : > { %1660 = vmatprep.subr.bf16.mxu0 %v3538_v2 }
  0x99   : > { %1661 = vmatpush2.bf16.msra.mxu0 %v3360_v45 }
  0x9a   : > { %1662 = vmatprep.subr.bf16.mxu0 %v3538_v2 }
  0x9d   : > { %1663 = vmatpush2.bf16.msra.mxu0 %v3361_v46 }
  0x9e   : > { %1931 = vmatprep.subr.bf16.mxu0 %v3367_v49 }
  0xee   : > { %v1079_v52 = vpop.f32.mrf.mxu1 }
  0xf0   : > { %v1081_v53 = vpop.f32.mrf.mxu1 }
  0xf2   : > { %v1083_v54 = vpop.f32.mrf.mxu1 }
  0xf3   : > { %v3382_v54 = vld [vmem:[%s4468_s7 + $0x84] ss:$16 sps:$4 sm:$0xff]  }
  0xf4   : > { %v1084_v55 = vpop.f32.mrf.mxu1 }
  0xf5   : > { %v3380_v55 = vld [vmem:[%s4468_s7 + $0x80] ss:$16 sps:$4 sm:$0xff]  }
 0x10c   : > { %v1038_v63 = vpop.f32.mrf.mxu0 }
 0x10d   : > { %v1039_v0 = vadd.f32 %v1038_v63, %v597_v61  ;;  %v3394_v61 = vld [vmem:[%s4468_s7 + $0x44] ss:$16 sps:$4 sm:$0xff]  }
 0x10e   : > { %v1040_v1 = vpop.f32.mrf.mxu0  ;;  %v3095_v13 = vpop.f32.mrf.mxu1 }
 0x10f   : > { %v1080_v3 = vadd.f32 %v1079_v52, %v1039_v0  ;;  %v1041_v4 = vadd.f32 %v1040_v1, %v601_v62  ;;  %v3376_v52 = vld [vmem:[%s4468_s7 + $0xa4] ss:$16 sps:$4 sm:$0xff]   ;;  %v3392_v62 = vld [vmem:[%s4468_s7 + $0x40] ss:$16 sps:$4 sm:$0xff]  }
 0x110   : > { %v1042_v6 = vpop.f32.mrf.mxu0  ;;  %v3096_v16 = vpop.f32.mrf.mxu1 }
 0x111   : > { %vm1166_vm2 = vcmp.gt.f32.partialorder %v1080_v3, 0.0  ;;  %v1169_v7 = vmul.f32 0.01, %v1080_v3  ;;  %v1082_v8 = vadd.f32 %v1081_v53, %v1041_v4  ;;  %v3097_v26 = vadd.f32 %v3096_v16, %v3095_v13  ;;  %v3374_v53 = vld [vmem:[%s4468_s7 + $0xa0] ss:$16 sps:$4 sm:$0xff]  }
 0x112   : > { %v1043_v9 = vpop.f32.mrf.mxu0  ;;  %v3098_v20 = vpop.f32.mrf.mxu1  ;;  %v1216_v4 = vld [vmem:[%s4465_s4] sm:$0x3] }
 0x113   : > { %v1170_v10 = vmul.f32 0.01, %v1082_v8  ;;  %vm1167_vm3 = vcmp.gt.f32.partialorder %v1082_v8, 0.0  ;;  %v1172_v12 = vsel %vm1166_vm2, %v1080_v3, %v1169_v7  ;;  %v1121_v28 = vadd.f32 %v3097_v26, %v605_v27  ;;  %v3379_v26 = vld [vmem:[%s4468_s7 + $0xac] ss:$16 sps:$4 sm:$0xff]  }
 0x114   : > { %v1175_v17 = vpack.c.bf16 %v1172_v12, %v1172_v12  ;;  %v3099_v21 = vpop.f32.mrf.mxu1  ;;  %v1221_v6 = vrot.slane %v1216_v4, %v3990_v58  ;;  %v1225_v7 = vrot.slane %v1216_v4, %v3996_v60  ;;  %v3377_v27 = vld [vmem:[%s4468_s7 + $0xa8] ss:$16 sps:$4 sm:$0xff]  }
 0x115   : > { %v1173_v14 = vsel %vm1167_vm3, %v1082_v8, %v1170_v10  ;;  %v3365_v21 = vld [vmem:[%s4468_s7 + $0xe8] ss:$16 sps:$4 sm:$0xff]  }
 0x116   : > { %v1176_v15 = vpack.c.bf16 %v1173_v14, %v1173_v14  ;;  %v3428_v4 = vld [vmem:[%s4470_s9 + $0x40] ss:$8 sps:$4 sm:$0xff]  }
 0x118   : > { %1459 = vmatprep.mubr.bf16.mxu1 %v1176_v15 }
 0x119   : > { %1460 = vmatmul.mubr.bf16.vlgmr.msra.gmra.mxu1 %v1175_v17 }
 0x11a   : > { %1479 = vmatpush1.bf16.msra.mxu1 %v1422_v18  ;;  %1500 = vmatprep.mubr.bf16.mxu1 %v3538_v2 }
 0x11b   : > { %1480 = vmatprep.subr.bf16.mxu1 %v3345_v19 }
 0x11e   : > { %1481 = vmatpush1.bf16.msra.mxu1 %v3343_v22 }
 0x11f   : > { %1482 = vmatprep.subr.bf16.mxu1 %v3348_v23  ;;  %v3373_v23 = vld [vmem:[%s4468_s7 + $0xcc] ss:$16 sps:$4 sm:$0xff]  }
 0x122   : > { %1483 = vmatpush1.bf16.msra.mxu1 %v3346_v24  ;;  %v3371_v24 = vld [vmem:[%s4468_s7 + $0xc8] ss:$16 sps:$4 sm:$0xff]  }
 0x123   : > { %1890 = vmatprep.subr.bf16.mxu1 %v3364_v48 }
 0x12c   : > { %v1160_v29 = vpop.f32.mrf.mxu0 }
 0x12d   : > { %v1161_v30 = vadd.f32 %v1160_v29, %v1121_v28  ;;  %v3385_v28 = vld [vmem:[%s4468_s7 + $0x8c] ss:$16 sps:$4 sm:$0xff]  }
 0x12e   : > { %v3159_v31 = vpop.f32.mrf.mxu0  ;;  %v3391_v29 = vld [vmem:[%s4468_s7 + $0x6c] ss:$16 sps:$4 sm:$0xff]  }
 0x12f   : > { %vm1168_vm4 = vcmp.gt.f32.partialorder %v1161_v30, 0.0  ;;  %v1171_v32 = vmul.f32 0.01, %v1161_v30  ;;  %v3397_v31 = vld [vmem:[%s4468_s7 + $0x4c] ss:$16 sps:$4 sm:$0xff]  }
 0x130   : > { %v1163_v33 = vpop.f32.mrf.mxu0 }
 0x131   : > { %v1174_v34 = vsel %vm1168_vm4, %v1161_v30, %v1171_v32  ;;  %v3389_v30 = vld [vmem:[%s4468_s7 + $0x68] ss:$16 sps:$4 sm:$0xff]   ;;  %v3400_v33 = vld [vmem:[%s4468_s7 + $0x24] ss:$16 sps:$4 sm:$0xff]  }
 0x132   : > { %v1177_v35 = vpack.c.bf16 %v1174_v34, %v1174_v34  ;;  %v3160_v36 = vpop.f32.mrf.mxu0  ;;  %v3395_v32 = vld [vmem:[%s4468_s7 + $0x48] ss:$16 sps:$4 sm:$0xff]   ;;  %v3403_v34 = vld [vmem:[%s4468_s7 + $0x2c] ss:$16 sps:$4 sm:$0xff]  }
 0x133   : > { %v3401_v36 = vld [vmem:[%s4468_s7 + $0x28] ss:$16 sps:$4 sm:$0xff]  }
 0x134   : > { %2939 = vmatmul.mubr.msk.bf16.vlgmr.msra.gmra.mxu1 %vm1416_vm5, %v1177_v35  ;;  %v3398_v35 = vld [vmem:[%s4468_s7 + $0x20] ss:$16 sps:$4 sm:$0xff]  }
 0x135   : > { %1922 = vmatprep.mubr.bf16.mxu1 %v3538_v2  ;;  %1891 = vmatpush1.bf16.msra.mxu1 %v3362_v47 }
 0x136   : > { %1892 = vmatprep.subr.bf16.mxu1 %v3370_v50  ;;  %v3410_v50 = vld [vmem:[%s4470_s9 + $0x70] ss:$8 sps:$4 sm:$0xff]  }
 0x139   : > { %1893 = vmatpush1.bf16.msra.mxu1 %v3368_v51  ;;  %v3413_v51 = vld [vmem:[%s4470_s9 + $0x170] ss:$8 sps:$4 sm:$0xff]  }
 0x13a   : > { %1894 = vmatprep.subr.bf16.mxu1 %v3376_v52 }
 0x13d   : > { %1895 = vmatpush1.bf16.msra.mxu1 %v3374_v53 }
 0x13e   : > { %1896 = vmatprep.subr.bf16.mxu1 %v3382_v54  ;;  %v3418_v54 = vld [vmem:[%s4470_s9 + $0x64] ss:$8 sps:$4 sm:$0xff]  }
 0x141   : > { %1897 = vmatpush1.bf16.msra.mxu1 %v3380_v55  ;;  %v3421_v55 = vld [vmem:[%s4470_s9 + $0x164] ss:$8 sps:$4 sm:$0xff]  }
 0x142   : > { %1898 = vmatprep.subr.bf16.mxu1 %v3388_v56  ;;  %v3416_v56 = vld [vmem:[%s4470_s9 + $0x60] ss:$8 sps:$4 sm:$0xff]  }
 0x145   : > { %1899 = vmatpush1.bf16.msra.mxu1 %v3386_v59  ;;  %v3419_v59 = vld [vmem:[%s4470_s9 + $0x160] ss:$8 sps:$4 sm:$0xff]  }
 0x146   : > { %1900 = vmatprep.subr.bf16.mxu1 %v3394_v61  ;;  %v3424_v61 = vld [vmem:[%s4470_s9 + $0x54] ss:$8 sps:$4 sm:$0xff]  }
 0x149   : > { %1901 = vmatpush1.bf16.msra.mxu1 %v3392_v62  ;;  %v3427_v62 = vld [vmem:[%s4470_s9 + $0x154] ss:$8 sps:$4 sm:$0xff]  }
 0x14a   : > { %1902 = vmatprep.subr.bf16.mxu1 %v3400_v33  ;;  %v3470_v33 = vld [vmem:[%s4470_s9 + $0xd0] ss:$8 sps:$4 sm:$0xff]  }
 0x14d   : > { %1903 = vmatpush1.bf16.msra.mxu1 %v3398_v35  ;;  %v3478_v35 = vld [vmem:[%s4470_s9 + $0xc4] ss:$8 sps:$4 sm:$0xff]  }
 0x14e   : > { %1904 = vmatprep.subr.bf16.mxu1 %v3406_v37  ;;  %v3476_v37 = vld [vmem:[%s4470_s9 + $0xc0] ss:$8 sps:$4 sm:$0xff]  }
 0x151   : > { %1905 = vmatpush1.bf16.msra.mxu1 %v3404_v39  ;;  %v3484_v39 = vld [vmem:[%s4470_s9 + $0xb4] ss:$8 sps:$4 sm:$0xff]  }
 0x152   : > { %2384 = vmatprep.subr.bf16.mxu1 %v3412_v41  ;;  %v3482_v41 = vld [vmem:[%s4470_s9 + $0xb0] ss:$8 sps:$4 sm:$0xff]  }
 0x1d9   : > { %v1461_v63 = vpop.f32.mrf.mxu1 }
 0x1da   : > { %v1462_v8 = vadd.f32 %v1461_v63, %v1221_v6  ;;  %v3422_v63 = vld [vmem:[%s4470_s9 + $0x50] ss:$8 sps:$4 sm:$0xff]   ;;  %v3431_v6 = vld [vmem:[%s4470_s9 + $0x140] ss:$8 sps:$4 sm:$0xff]  }
 0x1db   : > { %v1463_v0 = vpop.f32.mrf.mxu1 }
 0x1dc   : > { %v1464_v10 = vadd.f32 %v1463_v0, %v1225_v7  ;;  %v3425_v0 = vld [vmem:[%s4470_s9 + $0x150] ss:$8 sps:$4 sm:$0xff]   ;;  %v3436_v7 = vld [vmem:[%s4470_s9 + $0x34] ss:$8 sps:$4 sm:$0xff]  }
 0x1dd   : > { %v1465_v1 = vpop.f32.mrf.mxu1 }
 0x1de   : > { %v3430_v1 = vld [vmem:[%s4470_s9 + $0x44] ss:$8 sps:$4 sm:$0xff]  }
 0x1df   : > { %v1466_v3 = vpop.f32.mrf.mxu1 }
 0x1e0   : > { %v3433_v3 = vld [vmem:[%s4470_s9 + $0x144] ss:$8 sps:$4 sm:$0xff]  }
 0x1f4   : > { %v1502_v9 = vpop.f32.mrf.mxu1 }
 0x1f5   : > { %v1503_v11 = vadd.f32 %v1502_v9, %v1462_v8  ;;  %v3439_v8 = vld [vmem:[%s4470_s9 + $0x134] ss:$8 sps:$4 sm:$0xff]   ;;  %v3434_v9 = vld [vmem:[%s4470_s9 + $0x30] ss:$8 sps:$4 sm:$0xff]  }
 0x1f6   : > { %v1504_v12 = vpop.f32.mrf.mxu1 }
 0x1f7   : > { %vm1509_vm7 = vcmp.gt.f32.partialorder %v1503_v11, 0.0  ;;  %v1511_v13 = vmul.f32 0.01, %v1503_v11  ;;  %v1505_v14 = vadd.f32 %v1504_v12, %v1464_v10  ;;  %v3437_v10 = vld [vmem:[%s4470_s9 + $0x130] ss:$8 sps:$4 sm:$0xff]  }
 0x1f8   : > { %v1506_v15 = vpop.f32.mrf.mxu1  ;;  %v3445_v12 = vld [vmem:[%s4470_s9 + $0x124] ss:$8 sps:$4 sm:$0xff]  }
 0x1f9   : > { %vm1510_vm8 = vcmp.gt.f32.partialorder %v1505_v14, 0.0  ;;  %v1512_v16 = vmul.f32 0.01, %v1505_v14  ;;  %v1513_v17 = vsel %vm1509_vm7, %v1503_v11, %v1511_v13  ;;  %v3442_v11 = vld [vmem:[%s4470_s9 + $0x24] ss:$8 sps:$4 sm:$0xff]  }
 0x1fa   : > { %v1507_v18 = vpop.f32.mrf.mxu1  ;;  %v1515_v22 = vpack.c.bf16 %v1513_v17, %v1513_v17  ;;  %v3440_v13 = vld [vmem:[%s4470_s9 + $0x20] ss:$8 sps:$4 sm:$0xff]   ;;  %v3448_v15 = vld [vmem:[%s4470_s9 + $0x14] ss:$8 sps:$4 sm:$0xff]   ;;  %v3446_v17 = vld [vmem:[%s4470_s9 + $0x10] ss:$8 sps:$4 sm:$0xff]  }
 0x1fb   : > { %v1514_v19 = vsel %vm1510_vm8, %v1505_v14, %v1512_v16  ;;  %v3443_v14 = vld [vmem:[%s4470_s9 + $0x120] ss:$8 sps:$4 sm:$0xff]   ;;  %v3451_v16 = vld [vmem:[%s4470_s9 + $0x114] ss:$8 sps:$4 sm:$0xff]   ;;  %v3449_v18 = vld [vmem:[%s4470_s9 + $0x110] ss:$8 sps:$4 sm:$0xff]  }
 0x1fc   : > { %v1516_v20 = vpack.c.bf16 %v1514_v19, %v1514_v19  ;;  %v3454_v19 = vld [vmem:[%s4470_s9 + $0x4] ss:$8 sps:$4 sm:$0xff]  }
 0x1fe   : > { %2954 = vmatprep.mubr.msk.bf16.mxu0 %vm1624_vm9, %v1516_v20  ;;  %v3457_v20 = vld [vmem:[%s4470_s9 + $0x104] ss:$8 sps:$4 sm:$0xff]  }
 0x1ff   : > { %1665 = vmatmul.mubr.bf16.vlgmr.msra.gmra.mxu0 %v1515_v22  ;;  %v3455_v22 = vld [vmem:[%s4470_s9 + $0x100] ss:$8 sps:$4 sm:$0xff]  }
 0x200   : > { %1932 = vmatpush1.bf16.msra.mxu0 %v3365_v21  ;;  %1963 = vmatprep.mubr.bf16.mxu0 %v3538_v2  ;;  %v3383_v2 = vld [vmem:[%s4468_s7 + $0x88] ss:$16 sps:$4 sm:$0xff]  }
 0x201   : > { %1933 = vmatprep.subr.bf16.mxu0 %v3373_v23  ;;  %v3452_v21 = vld [vmem:[%s4470_s9] ss:$8 sps:$4 sm:$0xff]   ;;  %v3460_v23 = vld [vmem:[%s4470_s9 + $0xf4] ss:$8 sps:$4 sm:$0xff]  }
 0x204   : > { %1934 = vmatpush1.bf16.msra.mxu0 %v3371_v24  ;;  %v3463_v24 = vld [vmem:[%s4470_s9 + $0x1f4] ss:$8 sps:$4 sm:$0xff]  }
 0x205   : > { %1935 = vmatprep.subr.bf16.mxu0 %v3379_v26  ;;  %v3458_v26 = vld [vmem:[%s4470_s9 + $0xf0] ss:$8 sps:$4 sm:$0xff]  }
 0x208   : > { %1936 = vmatpush1.bf16.msra.mxu0 %v3377_v27  ;;  %v3461_v27 = vld [vmem:[%s4470_s9 + $0x1f0] ss:$8 sps:$4 sm:$0xff]  }
 0x209   : > { %1937 = vmatprep.subr.bf16.mxu0 %v3385_v28  ;;  %v3466_v28 = vld [vmem:[%s4470_s9 + $0xe4] ss:$8 sps:$4 sm:$0xff]  }
 0x20c   : > { %1938 = vmatpush1.bf16.msra.mxu0 %v3383_v2  ;;  %v3469_v2 = vld [vmem:[%s4470_s9 + $0x1e4] ss:$8 sps:$4 sm:$0xff]  }
 0x20d   : > { %1939 = vmatprep.subr.bf16.mxu0 %v3391_v29  ;;  %v3464_v29 = vld [vmem:[%s4470_s9 + $0xe0] ss:$8 sps:$4 sm:$0xff]  }
 0x210   : > { %1940 = vmatpush1.bf16.msra.mxu0 %v3389_v30  ;;  %v3467_v30 = vld [vmem:[%s4470_s9 + $0x1e0] ss:$8 sps:$4 sm:$0xff]  }
 0x211   : > { %1941 = vmatprep.subr.bf16.mxu0 %v3397_v31  ;;  %v3472_v31 = vld [vmem:[%s4470_s9 + $0xd4] ss:$8 sps:$4 sm:$0xff]  }
 0x214   : > { %1942 = vmatpush1.bf16.msra.mxu0 %v3395_v32  ;;  %v3475_v32 = vld [vmem:[%s4470_s9 + $0x1d4] ss:$8 sps:$4 sm:$0xff]  }
 0x215   : > { %1943 = vmatprep.subr.bf16.mxu0 %v3403_v34  ;;  %v3473_v34 = vld [vmem:[%s4470_s9 + $0x1d0] ss:$8 sps:$4 sm:$0xff]  }
 0x218   : > { %1944 = vmatpush1.bf16.msra.mxu0 %v3401_v36  ;;  %v3481_v36 = vld [vmem:[%s4470_s9 + $0x1c4] ss:$8 sps:$4 sm:$0xff]  }
 0x219   : > { %1945 = vmatprep.subr.bf16.mxu0 %v3409_v38  ;;  %v3479_v38 = vld [vmem:[%s4470_s9 + $0x1c0] ss:$8 sps:$4 sm:$0xff]  }
 0x21c   : > { %1946 = vmatpush1.bf16.msra.mxu0 %v3407_v40  ;;  %v3487_v40 = vld [vmem:[%s4470_s9 + $0x1b4] ss:$8 sps:$4 sm:$0xff]  }
 0x21d   : > { %2425 = vmatprep.subr.bf16.mxu0 %v3415_v42  ;;  %v3485_v42 = vld [vmem:[%s4470_s9 + $0x1b0] ss:$8 sps:$4 sm:$0xff]  }
 0x2bf   : > { %v1666_v44 = vpop.f32.mrf.mxu0 }
 0x2c0   : > { %v1667_v45 = vadd.f32 %v2940_v43, %v1666_v44  ;;  %v3490_v43 = vld [vmem:[%s4470_s9 + $0xa4] ss:$8 sps:$4 sm:$0xff]  }
 0x2c1   : > { %v1668_v46 = vpop.f32.mrf.mxu0  ;;  %v3493_v44 = vld [vmem:[%s4470_s9 + $0x1a4] ss:$8 sps:$4 sm:$0xff]  }
 0x2c2   : > { %vm1672_vm10 = vcmp.gt.f32.partialorder %v1667_v45, 0.0  ;;  %v1673_v47 = vmul.f32 0.01, %v1667_v45  ;;  %v3491_v46 = vld [vmem:[%s4470_s9 + $0x1a0] ss:$8 sps:$4 sm:$0xff]  }
 0x2c3   : > { %v1669_v48 = vpop.f32.mrf.mxu0 }
 0x2c4   : > { %v1674_v49 = vsel %vm1672_vm10, %v1667_v45, %v1673_v47  ;;  %v3488_v45 = vld [vmem:[%s4470_s9 + $0xa0] ss:$8 sps:$4 sm:$0xff]   ;;  %v3496_v47 = vld [vmem:[%s4470_s9 + $0x94] ss:$8 sps:$4 sm:$0xff]  }
 0x2c5   : > { %v1675_v52 = vpack.c.bf16 %v1674_v49, %v1674_v49  ;;  %v1670_v53 = vpop.f32.mrf.mxu0  ;;  %v3499_v48 = vld [vmem:[%s4470_s9 + $0x194] ss:$8 sps:$4 sm:$0xff]   ;;  %v3494_v49 = vld [vmem:[%s4470_s9 + $0x90] ss:$8 sps:$4 sm:$0xff]  }
 0x2c6   : > { %v3503_v53 = vld [vmem:[%s4470_s9 + $0x180] ss:$8 sps:$4 sm:$0xff]  }
 0x2c7   : > { %1923 = vmatmul.mubr.bf16.vlgmr.msra.gmra.mxu1 %v1675_v52  ;;  %1964 = vmatmul.mubr.bf16.vlgmr.msra.gmra.mxu0 %v1675_v52  ;;  %v3502_v52 = vld [vmem:[%s4470_s9 + $0x84] ss:$8 sps:$4 sm:$0xff]  }
 0x2c8   : > { %2385 = vmatpush1.bf16.msra.mxu1 %v3410_v50  ;;  %2426 = vmatpush1.bf16.msra.mxu0 %v3413_v51  ;;  %v3497_v50 = vld [vmem:[%s4470_s9 + $0x190] ss:$8 sps:$4 sm:$0xff]   ;;  %v3500_v51 = vld [vmem:[%s4470_s9 + $0x80] ss:$8 sps:$4 sm:$0xff]  }
 0x2c9   : > { %2386 = vmatprep.subr.bf16.mxu1 %v3418_v54  ;;  %2427 = vmatprep.subr.bf16.mxu0 %v3421_v55  ;;  %v3505_v54 = vld [vmem:[%s4470_s9 + $0x184] ss:$8 sps:$4 sm:$0xff]   ;;  %v3506_v55 = vld [vmem:[%s4472_s11 + $0x78] sm:$0xff]  }
 0x2cc   : > { %2387 = vmatpush1.bf16.msra.mxu1 %v3416_v56  ;;  %2428 = vmatpush1.bf16.msra.mxu0 %v3419_v59  ;;  %v1708_v56 = vld [vmem:[%s4469_s8] sm:$0xf]  ;;  %v1724_v59 = vsub.s32 3, %v3987_v57 }
 0x2cd   : > { %2388 = vmatprep.subr.bf16.mxu1 %v3424_v61  ;;  %2429 = vmatprep.subr.bf16.mxu0 %v3427_v62  ;;  %v1713_v61 = vrot.slane %v1708_v56, %v3990_v58  ;;  %v1721_v62 = vrot.slane %v1708_v56, %v604_v25 }
 0x2d0   : > { %2389 = vmatpush1.bf16.msra.mxu1 %v3422_v63  ;;  %2430 = vmatpush1.bf16.msra.mxu0 %v3425_v0 }
 0x2d1   : > { %2390 = vmatprep.subr.bf16.mxu1 %v3430_v1  ;;  %2431 = vmatprep.subr.bf16.mxu0 %v3433_v3  ;;  %v1717_v1 = vrot.slane %v1708_v56, %v3996_v60  ;;  %v1725_v3 = vrot.slane %v1708_v56, %v1724_v59 }
 0x2d4   : > { %2391 = vmatpush1.bf16.msra.mxu1 %v3428_v4  ;;  %2432 = vmatpush1.bf16.msra.mxu0 %v3431_v6 }
 0x2d5   : > { %2392 = vmatprep.subr.bf16.mxu1 %v3436_v7  ;;  %2433 = vmatprep.subr.bf16.mxu0 %v3439_v8 }
 0x2d8   : > { %2393 = vmatpush1.bf16.msra.mxu1 %v3434_v9  ;;  %2434 = vmatpush1.bf16.msra.mxu0 %v3437_v10 }
 0x2d9   : > { %2394 = vmatprep.subr.bf16.mxu1 %v3442_v11  ;;  %2435 = vmatprep.subr.bf16.mxu0 %v3445_v12 }
 0x2dc   : > { %2395 = vmatpush1.bf16.msra.mxu1 %v3440_v13  ;;  %2436 = vmatpush1.bf16.msra.mxu0 %v3443_v14 }
 0x2dd   : > { %2396 = vmatprep.subr.bf16.mxu1 %v3448_v15  ;;  %2437 = vmatprep.subr.bf16.mxu0 %v3451_v16 }
 0x2e0   : > { %2397 = vmatpush1.bf16.msra.mxu1 %v3446_v17  ;;  %2438 = vmatpush1.bf16.msra.mxu0 %v3449_v18 }
 0x2e1   : > { %2398 = vmatprep.subr.bf16.mxu1 %v3454_v19  ;;  %2439 = vmatprep.subr.bf16.mxu0 %v3457_v20 }
 0x2e4   : > { %2399 = vmatpush1.bf16.msra.mxu1 %v3452_v21  ;;  %2440 = vmatpush1.bf16.msra.mxu0 %v3455_v22  ;;  %v3507_v22 = vld [vmem:[%s4472_s11 + $0x38] sm:$0xff]  }
 0x2e5   : > { %2400 = vmatprep.subr.bf16.mxu1 %v3460_v23  ;;  %2441 = vmatprep.subr.bf16.mxu0 %v3463_v24 }
 0x2e8   : > { %2401 = vmatpush2.bf16.msra.mxu1 %v3458_v26  ;;  %2442 = vmatpush2.bf16.msra.mxu0 %v3461_v27  ;;  %v3508_v26 = vld [vmem:[%s4472_s11 + $0x70] sm:$0xff]  }
 0x2e9   : > { %2402 = vmatprep.subr.bf16.mxu1 %v3466_v28  ;;  %2443 = vmatprep.subr.bf16.mxu0 %v3469_v2  ;;  %v3509_v28 = vld [vmem:[%s4472_s11 + $0x30] sm:$0xff]   ;;  %v3510_v2 = vld [vmem:[%s4472_s11 + $0x68] sm:$0xff]  }
 0x2ec   : > { %2403 = vmatpush2.bf16.msra.mxu1 %v3464_v29  ;;  %2444 = vmatpush2.bf16.msra.mxu0 %v3467_v30  ;;  %v3511_v29 = vld [vmem:[%s4472_s11 + $0x28] sm:$0xff]   ;;  %v3512_v30 = vld [vmem:[%s4472_s11 + $0x60] sm:$0xff]  }
 0x2ed   : > { %2404 = vmatprep.subr.bf16.mxu1 %v3472_v31  ;;  %2445 = vmatprep.subr.bf16.mxu0 %v3475_v32  ;;  %v3513_v31 = vld [vmem:[%s4472_s11 + $0x20] sm:$0xff]   ;;  %v3514_v32 = vld [vmem:[%s4472_s11 + $0x58] sm:$0xff]  }
 0x2f0   : > { %2405 = vmatpush2.bf16.msra.mxu1 %v3470_v33  ;;  %2446 = vmatpush2.bf16.msra.mxu0 %v3473_v34  ;;  %v3515_v33 = vld [vmem:[%s4472_s11 + $0x18] sm:$0xff]   ;;  %v3516_v34 = vld [vmem:[%s4472_s11 + $0x50] sm:$0xff]  }
 0x2f1   : > { %2406 = vmatprep.subr.bf16.mxu1 %v3478_v35  ;;  %2447 = vmatprep.subr.bf16.mxu0 %v3481_v36  ;;  %v3517_v35 = vld [vmem:[%s4472_s11 + $0x10] sm:$0xff]   ;;  %v3518_v36 = vld [vmem:[%s4472_s11 + $0x48] sm:$0xff]  }
 0x2f4   : > { %2407 = vmatpush2.bf16.msra.mxu1 %v3476_v37  ;;  %2448 = vmatpush2.bf16.msra.mxu0 %v3479_v38  ;;  %v3519_v37 = vld [vmem:[%s4472_s11 + $0x8] sm:$0xff]   ;;  %v3520_v38 = vld [vmem:[%s4472_s11 + $0x40] sm:$0xff]  }
 0x2f5   : > { %2408 = vmatprep.subr.bf16.mxu1 %v3484_v39  ;;  %2449 = vmatprep.subr.bf16.mxu0 %v3487_v40  ;;  %v3521_v39 = vld [vmem:[%s4472_s11] sm:$0xff]   ;;  %v3522_v40 = vld [vmem:[%s4474_s13 + $0x38] sm:$0xff]  }
 0x2f8   : > { %2409 = vmatpush2.bf16.msra.mxu1 %v3482_v41  ;;  %2450 = vmatpush2.bf16.msra.mxu0 %v3485_v42  ;;  %v3523_v41 = vld [vmem:[%s4474_s13 + $0x30] sm:$0xff]   ;;  %v3524_v42 = vld [vmem:[%s4474_s13 + $0x28] sm:$0xff]  }
 0x2f9   : > { %2410 = vmatprep.subr.bf16.mxu1 %v3490_v43  ;;  %2451 = vmatprep.subr.bf16.mxu0 %v3493_v44  ;;  %v3525_v43 = vld [vmem:[%s4474_s13 + $0x20] sm:$0xff]   ;;  %v3526_v44 = vld [vmem:[%s4474_s13 + $0x18] sm:$0xff]  }
 0x2fc   : > { %2411 = vmatpush2.bf16.msra.mxu1 %v3488_v45  ;;  %2452 = vmatpush2.bf16.msra.mxu0 %v3491_v46  ;;  %v2052_v45 = vld [vmem:[%s4471_s10] sm:$0x3] }
 0x2fd   : > { %2412 = vmatprep.subr.bf16.mxu1 %v3496_v47  ;;  %2453 = vmatprep.subr.bf16.mxu0 %v3499_v48  ;;  %v2057_v46 = vrot.slane %v2052_v45, %v3990_v58  ;;  %v2061_v47 = vrot.slane %v2052_v45, %v3996_v60 }
 0x300   : > { %2413 = vmatpush2.bf16.msra.mxu1 %v3494_v49  ;;  %2454 = vmatpush2.bf16.msra.mxu0 %v3497_v50 }
 0x301   : > { %2414 = vmatprep.subr.bf16.mxu1 %v3502_v52  ;;  %2455 = vmatprep.subr.bf16.mxu0 %v3505_v54 }
 0x304   : > { %2415 = vmatpush2.bf16.msra.mxu1 %v3500_v51  ;;  %2456 = vmatpush2.bf16.msra.mxu0 %v3503_v53 }
 0x305   : > { %3161 = vmatprep.subr.bf16.mxu0 %v3539_v5  ;;  %3110 = vmatprep.subr.bf16.mxu1 %v3506_v55 }
 0x387   : > { %v1924_v63 = vpop.f32.mrf.mxu1  ;;  %v1965_v0 = vpop.f32.mrf.mxu0 }
 0x388   : > { %v1925_v4 = vadd.f32 %v1924_v63, %v1713_v61  ;;  %v1966_v6 = vadd.f32 %v1965_v0, %v1721_v62 }
 0x389   : > { %v1926_v7 = vpop.f32.mrf.mxu1  ;;  %v1967_v8 = vpop.f32.mrf.mxu0 }
 0x38a   : > { %v1976_v9 = vmul.f32 0.01, %v1925_v4  ;;  %vm1972_vm11 = vcmp.gt.f32.partialorder %v1925_v4, 0.0  ;;  %v1978_v10 = vmul.f32 0.01, %v1966_v6  ;;  %v1927_v11 = vadd.f32 %v1926_v7, %v1717_v1  ;;  %v3529_v7 = vld [vmem:[%s4474_s13] sm:$0xff]  }
 0x38b   : > { %v1968_v12 = vadd.f32 %v1967_v8, %v1725_v3  ;;  %v1928_v13 = vpop.f32.mrf.mxu1  ;;  %v1969_v14 = vpop.f32.mrf.mxu0  ;;  %vm1974_vm12 = vcmp.gt.f32.partialorder %v1966_v6, 0.0 }
 0x38c   : > { %vm1973_vm13 = vcmp.gt.f32.partialorder %v1927_v11, 0.0  ;;  %v1977_v57 = vmul.f32 0.01, %v1927_v11  ;;  %v1980_v16 = vsel %vm1972_vm11, %v1925_v4, %v1976_v9  ;;  %v1982_v18 = vsel %vm1974_vm12, %v1966_v6, %v1978_v10  ;;  %v3527_v4 = vld [vmem:[%s4474_s13 + $0x10] sm:$0xff]   ;;  %v3528_v6 = vld [vmem:[%s4474_s13 + $0x8] sm:$0xff]  }
 0x38d   : > { %v1929_v25 = vpop.f32.mrf.mxu1  ;;  %v1970_v15 = vpop.f32.mrf.mxu0  ;;  %vm1975_vm14 = vcmp.gt.f32.partialorder %v1968_v12, 0.0  ;;  %v1979_v17 = vmul.f32 0.01, %v1968_v12  ;;  %v1984_v23 = vpack.c.bf16 %v1980_v16, %v1980_v16  ;;  %v1986_v27 = vpack.c.bf16 %v1982_v18, %v1982_v18  ;;  %v3051_v9 = vld [vmem:[%s4473_s12] ss:$0 sm:$0xff] }
 0x38e   : > { %v1981_v19 = vsel %vm1973_vm13, %v1927_v11, %v1977_v57 }
 0x38f   : > { %v1985_v20 = vpack.c.bf16 %v1981_v19, %v1981_v19  ;;  %v1983_v21 = vsel %vm1975_vm14, %v1968_v12, %v1979_v17 }
 0x390   : > { %v1987_v24 = vpack.c.bf16 %v1983_v21, %v1983_v21 }
 0x391   : > { %2416 = vmatprep.mubr.bf16.mxu1 %v1985_v20 }
 0x392   : > { %2457 = vmatprep.mubr.bf16.mxu0 %v1987_v24  ;;  %2417 = vmatmul.mubr.bf16.vlgmr.msra.gmra.mxu1 %v1984_v23 }
 0x393   : > { %2458 = vmatmul.mubr.bf16.vlgmr.msra.gmra.mxu0 %v1986_v27  ;;  %3111 = vmatpush3.bf16.msra.mxu1 %v3507_v22 }
 0x394   : > { %3112 = vmatprep.subr.bf16.mxu1 %v3508_v26  ;;  %3177 = vmatprep.mubr.msk.bf16.mxu0 %vm3540_vm0, %v3539_v5 }
 0x395   : > { %3162 = vmatpush3.bf16.msra.mxu0 %v3522_v40 }
 0x396   : > { %3163 = vmatprep.subr.bf16.mxu0 %v3539_v5 }
 0x397   : > { %3113 = vmatpush3.bf16.msra.mxu1 %v3509_v28 }
 0x398   : > { %3114 = vmatprep.subr.bf16.mxu1 %v3510_v2 }
 0x399   : > { %3164 = vmatpush3.bf16.msra.mxu0 %v3523_v41 }
 0x39a   : > { %3165 = vmatprep.subr.bf16.mxu0 %v3539_v5 }
 0x39b   : > { %3115 = vmatpush3.bf16.msra.mxu1 %v3511_v29 }
 0x39c   : > { %3116 = vmatprep.subr.bf16.mxu1 %v3512_v30 }
 0x39d   : > { %3166 = vmatpush3.bf16.msra.mxu0 %v3524_v42 }
 0x39e   : > { %3167 = vmatprep.subr.bf16.mxu0 %v3539_v5 }
 0x39f   : > { %3117 = vmatpush3.bf16.msra.mxu1 %v3513_v31 }
 0x3a0   : > { %3118 = vmatprep.subr.bf16.mxu1 %v3514_v32 }
 0x3a1   : > { %3168 = vmatpush3.bf16.msra.mxu0 %v3525_v43 }
 0x3a2   : > { %3169 = vmatprep.subr.bf16.mxu0 %v3539_v5 }
 0x3a3   : > { %3119 = vmatpush3.bf16.msra.mxu1 %v3515_v33 }
 0x3a4   : > { %3120 = vmatprep.subr.bf16.mxu1 %v3516_v34 }
 0x3a5   : > { %3170 = vmatpush3.bf16.msra.mxu0 %v3526_v44 }
 0x3a6   : > { %3171 = vmatprep.subr.bf16.mxu0 %v3539_v5 }
 0x3a7   : > { %3121 = vmatpush3.bf16.msra.mxu1 %v3517_v35 }
 0x3a8   : > { %3122 = vmatprep.subr.bf16.mxu1 %v3518_v36 }
 0x3a9   : > { %3172 = vmatpush3.bf16.msra.mxu0 %v3527_v4 }
 0x3aa   : > { %3173 = vmatprep.subr.bf16.mxu0 %v3539_v5 }
 0x3ab   : > { %3123 = vmatpush3.bf16.msra.mxu1 %v3519_v37 }
 0x3ac   : > { %3124 = vmatprep.subr.bf16.mxu1 %v3520_v38 }
 0x3ad   : > { %3174 = vmatpush3.bf16.msra.mxu0 %v3528_v6 }
 0x3ae   : > { %3175 = vmatprep.subr.bf16.mxu0 %v3539_v5  ;;  %v3068_v5 = vld [vmem:[%s4475_s14] ss:$0 sm:$0xff] }
 0x3af   : > { %3125 = vmatpush3.bf16.msra.mxu1 %v3521_v39 }
 0x3b1   : > { %3176 = vmatpush3.bf16.msra.mxu0 %v3529_v7 }
 0x452   : > { %v2418_v48 = vpop.f32.mrf.mxu1 }
 0x453   : > { %v2419_v49 = vadd.f32 %v2418_v48, %v2057_v46  ;;  %v2459_v50 = vpop.f32.mrf.mxu0 }
 0x454   : > { %v2420_v51 = vpop.f32.mrf.mxu1 }
 0x455   : > { %v2460_v52 = vadd.f32 %v2459_v50, %v2419_v49  ;;  %v2421_v53 = vadd.f32 %v2420_v51, %v2061_v47  ;;  %v2461_v54 = vpop.f32.mrf.mxu0 }
 0x456   : > { %v2422_v55 = vpop.f32.mrf.mxu1 }
 0x457   : > { %vm2466_vm15 = vcmp.gt.f32.partialorder %v2460_v52, 0.0  ;;  %v2468_v56 = vmul.f32 0.01, %v2460_v52  ;;  %v2462_v59 = vadd.f32 %v2461_v54, %v2421_v53  ;;  %v2463_v61 = vpop.f32.mrf.mxu0 }
 0x458   : > { %v2423_v62 = vpop.f32.mrf.mxu1 }
 0x459   : > { %vm2467_vm0 = vcmp.gt.f32.partialorder %v2462_v59, 0.0  ;;  %v2469_v63 = vmul.f32 0.01, %v2462_v59  ;;  %v2464_v0 = vpop.f32.mrf.mxu0  ;;  %v2470_v1 = vsel %vm2466_vm15, %v2460_v52, %v2468_v56 }
 0x45a   : > { %v2472_v60 = vpack.c.bf16 %v2470_v1, %v2470_v1 }
 0x45b   : > { %v2471_v58 = vsel %vm2467_vm0, %v2462_v59, %v2469_v63 }
 0x45c   : > { %v2473_v3 = vpack.c.bf16 %v2471_v58, %v2471_v58 }
 0x45e   : > { %2641 = vmatprep.mubr.bf16.mxu1 %v2473_v3 }
 0x45f   : > { %2642 = vmatmul.mubr.bf16.vlgmr.msra.gmra.mxu1 %v2472_v60 }
 0x51f   : > { %v3126_v8 = vpop.f32.mrf.mxu1 }
 0x521   : > { %v3127_v10 = vpop.f32.mrf.mxu1 }
 0x522   : > { %v3128_v11 = vadd.f32 %v3127_v10, %v3126_v8 }
 0x523   : > { %v3129_v12 = vpop.f32.mrf.mxu1 }
 0x524   : > { %v2644_v13 = vadd.f32 %v3128_v11, %v3051_v9 }
 0x525   : > { %v3130_v14 = vpop.f32.mrf.mxu1 }
 0x526   : > { %vm2649_vm1 = vcmp.gt.f32.partialorder %v2644_v13, 0.0  ;;  %v2650_v57 = vmul.f32 0.01, %v2644_v13 }
 0x528   : > { %v2651_v25 = vsel %vm2649_vm1, %v2644_v13, %v2650_v57 }
 0x529   : > { %v2652_v15 = vpack.c.bf16 %v2651_v25, %v2651_v25 }
 0x52b   : > { %3178 = vmatmul.mubr.bf16.vlgmr.msra.gmra.mxu0 %v2652_v15 }
 0x5eb   : > { %v2758_v16 = vpop.f32.mrf.mxu0 }
 0x5ec   : > { %v2759_v17 = vadd.f32 %v3068_v5, %v2758_v16 }
 0x5ed   : > { %v3179_v18 = vpop.f32.mrf.mxu0 }
 0x5ee   : > { %2764 = vst [vmem:[%s492_s16] sm:$0xff] %v2759_v17 }
 0x5ef   : > { %v2761_v19 = vpop.f32.mrf.mxu0 }
 0x5f1   : > { %v3180_v20 = vpop.f32.mrf.mxu0 }
 0x5f2 PF: > { %s25_s18 = sadd.s32 1, %s3536_s18  }
 0x5f3   : > { %p22_p4 = scmp.ge.s32.totalorder %s25_s18, 4  }
 0x5f5   :  { %24 = sbr.rel (!%p22_p4) target bundleno = 1 (0x1), region = 110 }

</bundles_post_ra>
